<compile_context>
chip_gen: v7x
topology: tpu7x:2x2x1
jax: 0.10.0
libtpu: 0.0.40
codegen_flags: <defaults>
</compile_context>

<pallas_src>
import functools
import numpy as np

import jax
import jax.numpy as jnp
from jax import lax
from jax.experimental import pallas as pl
from jax.experimental.pallas import tpu as pltpu

F32 = jnp.float32
# MXU operand dtype for the big sampling / weight matmuls (accumulation stays f32 via
# preferred_element_type).  Set to jnp.float32 to disable mixed precision.
MXU_DT = jnp.bfloat16


# --------------------------------------------------------------------------- compiler params
def _vmem_limit_bytes():
    try:
        cap = int(pltpu.get_tpu_info().vmem_capacity_bytes)
    except Exception:
        cap = 64 * 1024 * 1024
    return max(32 * 1024 * 1024, (cap * 3) // 4)


def _cparams(n_grid_axes):
    return pltpu.CompilerParams(
        dimension_semantics=("parallel",) * n_grid_axes,
        vmem_limit_bytes=_vmem_limit_bytes())


# --------------------------------------------------------------------------- tile pickers
def _pick_ptile(P, target=512):
    """Largest Po tile dividing P, multiple of 8 (BlockSpec sublane rule), <= target."""
    if P <= target:
        return P
    cands = [d for d in range(8, target + 1, 8) if P % d == 0]
    return max(cands) if cands else P


def _pick_row_tile(H, W, target_pixels=2048):
    """Rows-per-tile for the fused scale/DyReLU kernel (tile = whole rows so the high-path
    bilinear upsample stays tile-local)."""
    if H * W <= target_pixels:
        return H
    cands = [r for r in range(1, H)
             if H % r == 0 and r * W <= target_pixels and (r * W) % 8 == 0]
    return max(cands) if cands else H


def _pick_wband(Wi, Cin, TP, budget_bytes=4 << 20):
    """W band so the live stage-A product (TP, WB*Cin) stays a few MiB."""
    cands = [w for w in range(1, Wi + 1)
             if Wi % w == 0 and TP * w * Cin * 4 <= budget_bytes]
    return max(cands) if cands else 1


# --------------------------------------------------------------------------- shared math
def _hsigmoid(x):
    # mmcv HSigmoid(bias=3, divisor=6) == h_sigmoid(h_max=1) == relu6(x + 3) / 6
    return jnp.clip((x + 3.0) / 6.0, 0.0, 1.0)


def _sigmoid(x):
    # sigmoid(x) == 0.5*(1 + tanh(x/2)) — exact, numerically robust, EUP-native tanh.
    return 0.5 * (jnp.tanh(0.5 * x) + 1.0)


# ------------------------------------------------------------------ 3x3 conv -> offset+mask (P,27)
def _offset_conv_kernel(xp_ref, w_ref, b_ref, om_ref, *, H, W, Cin):
    # Per-tap accumulation: live intermediate is (H*W, Cin), not a (H*W, 9*Cin) im2col buffer.
    wm = w_ref[...]                                                    # (9*Cin, 27) f32
    acc = jnp.zeros((H * W, 27), F32)
    for k in range(9):
        kh, kw = k // 3, k % 3
        # TODO(synk): at production sizes, tile over row bands to avoid the window slice +
        # reshape relayout copy per tap.
        win = xp_ref[0, kh:kh + H, kw:kw + W, :].reshape(H * W, Cin)
        acc = acc + jnp.dot(win, wm[k * Cin:(k + 1) * Cin, :], preferred_element_type=F32)
    res = acc + b_ref[...]
    # channels [0,18): raw offsets, [18,27): sigmoid(mask) — single lane-packed output.
    ch = lax.broadcasted_iota(jnp.int32, (H * W, 27), 1)
    om_ref[0] = jnp.where(ch < 18, res, _sigmoid(res))


def offset_conv(x, w9, b):
    # x: (B, H, W, Cin) f32; w9: (9*Cin, 27) tap-major rows; b: (27,) -> (B, H*W, 27) f32
    B, H, W, Cin = x.shape
    xp = jnp.pad(x, ((0, 0), (1, 1), (1, 1), (0, 0)))
    kern = functools.partial(_offset_conv_kernel, H=H, W=W, Cin=Cin)
    return pl.pallas_call(
        kern,
        out_shape=jax.ShapeDtypeStruct((B, H * W, 27), F32),
        grid=(B,),
        in_specs=[
            pl.BlockSpec((1, H + 2, W + 2, Cin), lambda bb: (bb, 0, 0, 0)),
            pl.BlockSpec((9 * Cin, 27), lambda bb: (0, 0)),
            pl.BlockSpec((1, 27), lambda bb: (0, 0)),
        ],
        out_specs=pl.BlockSpec((1, H * W, 27), lambda bb: (bb, 0, 0)),
        compiler_params=_cparams(1),
    )(xp, w9, b.reshape(1, 27))


# ---------------------------------------------- modulated deformable 3x3 conv, Po-tiled grid
def _mdconv_kernel(x_ref, om_ref, w_ref, b_ref, feat_ref, *,
                   Hi, Wi, Cin, Cout, Wo, stride, TP, WB):
    """DCNv2 (mmcv semantics) for one (batch, Po-tile) grid cell.

    x_ref : (1, Hi, Wi*Cin)  bf16, lane-dense
    om_ref: (1, TP, 27)      f32: per-tap (dy,dx) offsets [y0,x0,...], then sigmoid(mask)
    w_ref : (9*Cin, Cout)    bf16, tap-major rows (k = kh*3+kw)
    """
    t = pl.program_id(1)
    p0 = t * TP
    om = om_ref[0]
    wm = w_ref[...]
    lin = p0 + lax.broadcasted_iota(jnp.int32, (TP, 1), 0)
    oh = (lin // Wo).astype(F32)
    ow = (lin % Wo).astype(F32)
    hi_iota = lax.broadcasted_iota(jnp.int32, (TP, Hi), 1)
    wi_iota = lax.broadcasted_iota(jnp.int32, (TP, Wi), 1)

    n_wb = Wi // WB
    acc = jnp.zeros((TP, Cout), F32)
    for k in range(9):
        kh, kw = k // 3, k % 3
        sy = oh * float(stride) - 1.0 + float(kh) + om[:, 2 * k:2 * k + 1]
        sx = ow * float(stride) - 1.0 + float(kw) + om[:, 2 * k + 1:2 * k + 2]
        y0 = jnp.floor(sy)
        x0 = jnp.floor(sx)
        ly = sy - y0
        lx = sx - x0
        y0i = y0.astype(jnp.int32)
        x0i = x0.astype(jnp.int32)
        # Separable bilinear one-hots (fractional weights folded in).  Out-of-range neighbour
        # indices never match the in-range iota (mmcv per-neighbour zeroing) and fully-outside
        # samples yield an all-zero row (mmcv h_im/w_im validity gate) — no extra valid mask.
        oy = ((hi_iota == y0i).astype(F32) * (1.0 - ly) +
              (hi_iota == (y0i + 1)).astype(F32) * ly)                  # (TP, Hi)
        ox = ((wi_iota == x0i).astype(F32) * (1.0 - lx) +
              (wi_iota == (x0i + 1)).astype(F32) * lx)                  # (TP, Wi)
        ox = ox * om[:, 18 + k:19 + k]                                  # fold modulation mask
        oym = oy.astype(MXU_DT)
        col = jnp.zeros((TP, Cin), F32)
        for wb in range(n_wb):                                          # W-band accumulation
            xs = x_ref[0, :, wb * WB * Cin:(wb + 1) * WB * Cin]         # (Hi, WB*Cin) bf16
            tb = jnp.dot(oym, xs, preferred_element_type=F32)           # MXU: row interp
            oxb = ox[:, wb * WB:(wb + 1) * WB]
            col = col + jnp.sum(tb.reshape(TP, WB, Cin) * oxb[:, :, None], axis=1)  # VPU
        acc = acc + jnp.dot(col.astype(MXU_DT), wm[k * Cin:(k + 1) * Cin, :],
                            preferred_element_type=F32)                 # per-tap weight matmul
    feat_ref[0] = acc + b_ref[...]


def mdconv(x, om, w9, b, *, stride):
    """x: (B,Hi,Wi,Cin) f32; om: (B,Po,27) f32; w9: (9*Cin,Cout).  -> feat (B,Po,Cout) f32."""
    B, Hi, Wi, Cin = x.shape
    Cout = w9.shape[-1]
    Ho = (Hi + 2 - 3) // stride + 1
    Wo = (Wi + 2 - 3) // stride + 1
    Po = Ho * Wo
    assert om.shape[1] == Po
    TP = _pick_ptile(Po)
    nT = Po // TP
    WB = _pick_wband(Wi, Cin, TP)
    x2 = x.reshape(B, Hi, Wi * Cin).astype(MXU_DT)
    w9m = w9.astype(MXU_DT)
    kern = functools.partial(_mdconv_kernel, Hi=Hi, Wi=Wi, Cin=Cin, Cout=Cout,
                             Wo=Wo, stride=stride, TP=TP, WB=WB)
    # TODO(synk): Hi-band K-tiling / manual DMA + Buffered(1) on x2/w for the v7x production
    # low path where the full x2 block exceeds VMEM.
    return pl.pallas_call(
        kern,
        out_shape=jax.ShapeDtypeStruct((B, Po, Cout), F32),
        grid=(B, nT),
        in_specs=[
            pl.BlockSpec((1, Hi, Wi * Cin), lambda bb, tt: (bb, 0, 0)),
            pl.BlockSpec((1, TP, 27), lambda bb, tt: (bb, tt, 0)),
            pl.BlockSpec((9 * Cin, Cout), lambda bb, tt: (0, 0)),
            pl.BlockSpec((1, Cout), lambda bb, tt: (0, 0)),
        ],
        out_specs=pl.BlockSpec((1, TP, Cout), lambda bb, tt: (bb, tt, 0)),
        compiler_params=_cparams(2),
    )(x2, om, w9m, b.reshape(1, Cout))


# -------------------- fused: scale-attn scalars + (high upsample) + level sum + DyReLU, P-tiled
def _fuse_kernel(*refs, has_low, has_high, C, n_sum, Ho, Wo, Wu, rt):
    it = iter(refs)
    fm_ref = next(it); mm_ref = next(it)
    if has_low:
        fl_ref = next(it); ml_ref = next(it)
    if has_high:
        ch_ref = next(it); mh_ref = next(it); rh_ref = next(it); rw_ref = next(it)
    sw_ref = next(it); sb_ref = next(it)
    w1_ref = next(it); b1_ref = next(it); w2_ref = next(it); b2_ref = next(it)
    o_ref = next(it)

    def path_scale(mean):
        # scale_attn_module: GAP (== mean) -> 1x1 conv -> ReLU -> HSigmoid; scalar per batch.
        s = jnp.sum(mean * sw_ref[...], axis=1, keepdims=True) + sb_ref[...]
        return _hsigmoid(jnp.maximum(s, 0.0))

    s_mid = path_scale(mm_ref[0])
    f = fm_ref[0] * s_mid
    gmean = mm_ref[0] * s_mid                       # channel-mean of the running sum (exact)
    if has_low:
        s_low = path_scale(ml_ref[0])
        f = f + fl_ref[0] * s_low
        gmean = gmean + ml_ref[0] * s_low
    if has_high:
        s_high = path_scale(mh_ref[0])
        # bilinear align_corners=True upsample of the high-path conv output, tile-local:
        # H-interp = one MXU matmul, W-interp = small batched matmul (broadcast is tiny per tile).
        tt = pl.program_id(1)
        rh_tile = rh_ref[pl.ds(tt * rt, rt), :]                          # (rt, Ho)
        conv2 = ch_ref[0].reshape(Ho, Wo * C)                            # (Ho, Wo*C)
        th = jnp.dot(rh_tile, conv2, preferred_element_type=F32)         # (rt, Wo*C)
        t3 = th.reshape(rt, Wo, C)
        rwb = jnp.broadcast_to(rw_ref[...][None, :, :], (rt, Wu, Wo))
        up = jnp.einsum('hwv,hvc->hwc', rwb, t3, preferred_element_type=F32)   # (rt, Wu, C)
        f = f + up.reshape(rt * Wu, C) * s_high
        gmean = gmean + mh_ref[0] * s_high
    inv_n = 1.0 / float(n_sum)
    f = f * inv_n
    gmean = gmean * inv_n                           # == AdaptiveAvgPool2d(1)(sum_feat / n)

    # DyReLU: K2, use_bias, lambda_a=2, init_a=[1,0], init_b=[0,0]; split order a1,b1,a2,b2.
    y = jnp.maximum(jnp.dot(gmean, w1_ref[...], preferred_element_type=F32) + b1_ref[...], 0.0)
    y = jnp.dot(y, w2_ref[...], preferred_element_type=F32) + b2_ref[...]
    y = _hsigmoid(y)
    a1 = (y[:, 0:C] - 0.5) * 2.0 + 1.0
    c1 = y[:, C:2 * C] - 0.5
    a2 = (y[:, 2 * C:3 * C] - 0.5) * 2.0
    c2 = y[:, 3 * C:4 * C] - 0.5
    o_ref[0] = jnp.maximum(f * a1 + c1, f * a2 + c2)


def fuse_level(feat_mid, mean_mid, low, high, params, H, W, C):
    """low = None | (feat_low, mean_low); high = None | (conv_h, mean_high, RH, RW, Hh, Wh)."""
    B = feat_mid.shape[0]
    P = H * W
    has_low = low is not None
    has_high = high is not None
    n_sum = 1 + int(has_low) + int(has_high)
    rt = _pick_row_tile(H, W)
    TP = rt * W
    nT = H // rt

    feat_spec = pl.BlockSpec((1, TP, C), lambda bb, tt: (bb, tt, 0))
    mean_spec = pl.BlockSpec((1, 1, C), lambda bb, tt: (bb, 0, 0))

    args = [feat_mid, mean_mid]
    specs = [feat_spec, mean_spec]
    Hh = Wh = 1
    if has_low:
        feat_low, mean_low = low
        args += [feat_low, mean_low]
        specs += [feat_spec, mean_spec]
    if has_high:
        conv_h, mean_high, RH, RW, Hh, Wh = high
        args += [conv_h, mean_high, RH, RW]
        specs += [pl.BlockSpec((1, Hh * Wh, C), lambda bb, tt: (bb, 0, 0)),
                  mean_spec,
                  pl.BlockSpec((H, Hh), lambda bb, tt: (0, 0)),
                  pl.BlockSpec((W, Wh), lambda bb, tt: (0, 0))]
    Csq = params['fc1_w'].shape[1]
    args += [params['scale_w'], params['scale_b'],
             params['fc1_w'], params['fc1_b'], params['fc2_w'], params['fc2_b']]
    specs += [pl.BlockSpec((1, C), lambda bb, tt: (0, 0)),
              pl.BlockSpec((1, 1), lambda bb, tt: (0, 0)),
              pl.BlockSpec((C, Csq), lambda bb, tt: (0, 0)),
              pl.BlockSpec((1, Csq), lambda bb, tt: (0, 0)),
              pl.BlockSpec((Csq, 4 * C), lambda bb, tt: (0, 0)),
              pl.BlockSpec((1, 4 * C), lambda bb, tt: (0, 0))]

    kern = functools.partial(_fuse_kernel, has_low=has_low, has_high=has_high,
                             C=C, n_sum=n_sum, Ho=Hh, Wo=Wh, Wu=W, rt=rt)
    return pl.pallas_call(
        kern,
        out_shape=jax.ShapeDtypeStruct((B, P, C), F32),
        grid=(B, nT),
        in_specs=specs,
        out_specs=pl.BlockSpec((1, TP, C), lambda bb, tt: (bb, tt, 0)),
        compiler_params=_cparams(2),
    )(*args)


# ---------------------------------------------------------------------------- wrapper helpers
def _interp_matrix(n_out, n_in):
    # PyTorch bilinear, align_corners=True
    src = np.arange(n_out) * (n_in - 1) / max(n_out - 1, 1)
    low = np.clip(np.floor(src).astype(np.int64), 0, n_in - 1)
    frac = src - low
    high = np.clip(low + 1, 0, n_in - 1)
    m = np.zeros((n_out, n_in), np.float32)
    m[np.arange(n_out), low] += (1.0 - frac).astype(np.float32)
    m[np.arange(n_out), high] += frac.astype(np.float32)
    return m


def _reinterpret_cmap(t_flat, H, W, Ho, Wo):
    """mmcv raw-pointer reinterpretation of a contiguous NCHW (C,H,W) buffer as (C,Ho,Wo).
    t_flat: (B, H*W, C) NHWC-flat -> (B, Ho*Wo, C)."""
    B, P, C = t_flat.shape
    chw = jnp.transpose(t_flat.reshape(B, H, W, C), (0, 3, 1, 2)).reshape(B, C * H * W)
    out = chw[:, :C * Ho * Wo].reshape(B, C, Ho * Wo)
    return jnp.transpose(out, (0, 2, 1))


def _reinterpret_om(om, H, W, Ho, Wo):
    off = _reinterpret_cmap(om[..., :18], H, W, Ho, Wo)
    msk = _reinterpret_cmap(om[..., 18:], H, W, Ho, Wo)
    return jnp.concatenate([off, msk], axis=-1)


def init_dyhead_params(key, C):
    ks = jax.random.split(key, 10)
    Csq = C // 4  # DyReLU reduction=4

    def nrm(k, shape, std):
        return jax.random.normal(k, shape, F32) * std

    # Fused conv weights are (9*Cin, Cout), rows tap-major: W9[k*Cin + c, o] == torch_w[o,c,kh,kw].
    # zero_init_offset is disabled (synthetic params) so the deformable sampling path is
    # exercised with non-trivial fractional offsets.
    return dict(
        offset_w=nrm(ks[0], (9 * C, 27), 0.1), offset_b=jnp.zeros((27,), F32),
        mid_w=nrm(ks[1], (9 * C, C), 0.1), mid_b=nrm(ks[2], (C,), 0.01),
        low_w=nrm(ks[3], (9 * C, C), 0.1), low_b=nrm(ks[4], (C,), 0.01),
        high_w=nrm(ks[5], (9 * C, C), 0.1), high_b=nrm(ks[6], (C,), 0.01),
        scale_w=nrm(ks[7], (1, C), 0.01), scale_b=jnp.zeros((1, 1), F32),
        fc1_w=nrm(ks[8], (C, Csq), 0.1), fc1_b=jnp.zeros((1, Csq), F32),
        fc2_w=nrm(ks[9], (Csq, 4 * C), 0.1), fc2_b=jnp.zeros((1, 4 * C), F32),
    )


def dyhead_block_forward(params, x_list):
    """x_list: NHWC features (B, H_l, W_l, C), spatial size halving with level."""
    L = len(x_list)
    outs = []
    for level in range(L):
        xl = x_list[level]
        B, H, W, C = xl.shape
        P = H * W

        om = offset_conv(xl, params['offset_w'], params['offset_b'])       # (B, P, 27)

        feat_mid = mdconv(xl, om, params['mid_w'], params['mid_b'], stride=1)
        mean_mid = jnp.mean(feat_mid, axis=1, keepdims=True)               # cheap reduction pass

        low = None
        if level > 0:
            feat_low = mdconv(x_list[level - 1], om,
                              params['low_w'], params['low_b'], stride=2)
            mean_low = jnp.mean(feat_low, axis=1, keepdims=True)
            low = (feat_low, mean_low)

        high = None
        if level < L - 1:
            xh = x_list[level + 1]
            Hh, Wh = xh.shape[1], xh.shape[2]
            om_h = _reinterpret_om(om, H, W, Hh, Wh)
            conv_h = mdconv(xh, om_h, params['high_w'], params['high_b'], stride=1)
            RH = jnp.asarray(_interp_matrix(H, Hh))                        # (H, Hh)
            RW = jnp.asarray(_interp_matrix(W, Wh))                        # (W, Wh)
            # channel-mean of the *upsampled* high feature: bilinear interp is linear, so the
            # mean is a fixed per-pixel weighting of the (small) conv output.
            wflat = (jnp.sum(RH, axis=0)[:, None] * jnp.sum(RW, axis=0)[None, :]).reshape(-1)
            mean_high = (jnp.einsum('bpc,p->bc', conv_h, wflat) / float(P))[:, None, :]
            high = (conv_h, mean_high, RH, RW, Hh, Wh)

        out_flat = fuse_level(feat_mid, mean_mid, low, high, params, H, W, C)   # (B, P, C)
        outs.append(out_flat.reshape(B, H, W, C))
    return outs


if __name__ == "__main__":
    key = jax.random.PRNGKey(0)
    B, C = 2, 8
    sizes = [(16, 16), (8, 8), (4, 4)]   # FPN-style pyramid levels

    kx, kp = jax.random.split(key)
    xk = jax.random.split(kx, len(sizes))
    # PyTorch module consumes NCHW; build NCHW then transpose to the kernels' NHWC layout.
    x_nchw = [jax.random.normal(k, (B, C, h, w), F32) for k, (h, w) in zip(xk, sizes)]
    x_nhwc = [jnp.transpose(t, (0, 2, 3, 1)) for t in x_nchw]

    params = init_dyhead_params(kp, C)
    outs_nhwc = dyhead_block_forward(params, x_nhwc)
    outs_nchw = [jnp.transpose(o, (0, 3, 1, 2)) for o in outs_nhwc]

    for o in outs_nchw:
        jax.block_until_ready(o)
        assert bool(jnp.all(jnp.isfinite(o)))
    print("KERNEL_OK")
</pallas_src>

<mosaic_0001>
module attributes {stable_mosaic.version = 11 : i64} {
  func.func @_offset_conv_kernel(%arg0: i32, %arg1: memref<1x18x18x8xf32, #tpu.memory_space<vmem>>, %arg2: memref<72x27xf32, #tpu.memory_space<vmem>>, %arg3: memref<1x27xf32, #tpu.memory_space<vmem>>, %arg4: memref<1x256x27xf32, #tpu.memory_space<vmem>>) attributes {dimension_semantics = [#tpu.dimension_semantics<parallel>], iteration_bounds = array<i64: 2>, scalar_prefetch = 0 : i64, scratch_operands = 0 : i64, tpu.core_type = #tpu.core_type<tc>, window_params = [{transform_indices = @transform_0, window_bounds = array<i64: 1, 18, 18, 8>}, {pipeline_mode = #tpu.pipeline_mode<synchronous>, transform_indices = @transform_1, window_bounds = array<i64: 72, 27>}, {pipeline_mode = #tpu.pipeline_mode<synchronous>, transform_indices = @transform_2, window_bounds = array<i64: 1, 27>}, {transform_indices = @transform_3, window_bounds = array<i64: 1, 256, 27>}]} {
    %c0 = arith.constant 0 : index
    %c0_0 = arith.constant 0 : index
    %0 = vector.load %arg2[%c0, %c0_0] : memref<72x27xf32, #tpu.memory_space<vmem>>, vector<72x27xf32>
    %cst = arith.constant 0.000000e+00 : f32
    %1 = vector.broadcast %cst : f32 to vector<256x27xf32>
    %c0_1 = arith.constant 0 : index
    %c0_2 = arith.constant 0 : index
    %c0_3 = arith.constant 0 : index
    %c0_4 = arith.constant 0 : index
    %2 = vector.load %arg1[%c0_1, %c0_2, %c0_3, %c0_4] : memref<1x18x18x8xf32, #tpu.memory_space<vmem>>, vector<1x16x16x8xf32>
    %3 = vector.shape_cast %2 : vector<1x16x16x8xf32> to vector<16x16x8xf32>
    %4 = vector.shape_cast %3 : vector<16x16x8xf32> to vector<256x8xf32>
    %5 = vector.extract_strided_slice %0 {offsets = [0, 0], sizes = [8, 27], strides = [1, 1]} : vector<72x27xf32> to vector<8x27xf32>
    %cst_5 = arith.constant dense<0.000000e+00> : vector<256x27xf32>
    %6 = tpu.matmul %4, %5, %cst_5 {dimension_numbers = #tpu.dot_dimension_numbers<[1], [0], [0], [1], [0, 0, 1, 1], [], []>} : vector<256x8xf32>, vector<8x27xf32>, vector<256x27xf32> -> vector<256x27xf32>
    %7 = arith.addf %1, %6 : vector<256x27xf32>
    %c0_6 = arith.constant 0 : index
    %c0_7 = arith.constant 0 : index
    %c1 = arith.constant 1 : index
    %c0_8 = arith.constant 0 : index
    %8 = vector.load %arg1[%c0_6, %c0_7, %c1, %c0_8] : memref<1x18x18x8xf32, #tpu.memory_space<vmem>>, vector<1x16x16x8xf32>
    %9 = vector.shape_cast %8 : vector<1x16x16x8xf32> to vector<16x16x8xf32>
    %10 = vector.shape_cast %9 : vector<16x16x8xf32> to vector<256x8xf32>
    %11 = vector.extract_strided_slice %0 {offsets = [8, 0], sizes = [8, 27], strides = [1, 1]} : vector<72x27xf32> to vector<8x27xf32>
    %cst_9 = arith.constant dense<0.000000e+00> : vector<256x27xf32>
    %12 = tpu.matmul %10, %11, %cst_9 {dimension_numbers = #tpu.dot_dimension_numbers<[1], [0], [0], [1], [0, 0, 1, 1], [], []>} : vector<256x8xf32>, vector<8x27xf32>, vector<256x27xf32> -> vector<256x27xf32>
    %13 = arith.addf %7, %12 : vector<256x27xf32>
    %c0_10 = arith.constant 0 : index
    %c0_11 = arith.constant 0 : index
    %c2 = arith.constant 2 : index
    %c0_12 = arith.constant 0 : index
    %14 = vector.load %arg1[%c0_10, %c0_11, %c2, %c0_12] : memref<1x18x18x8xf32, #tpu.memory_space<vmem>>, vector<1x16x16x8xf32>
    %15 = vector.shape_cast %14 : vector<1x16x16x8xf32> to vector<16x16x8xf32>
    %16 = vector.shape_cast %15 : vector<16x16x8xf32> to vector<256x8xf32>
    %17 = vector.extract_strided_slice %0 {offsets = [16, 0], sizes = [8, 27], strides = [1, 1]} : vector<72x27xf32> to vector<8x27xf32>
    %cst_13 = arith.constant dense<0.000000e+00> : vector<256x27xf32>
    %18 = tpu.matmul %16, %17, %cst_13 {dimension_numbers = #tpu.dot_dimension_numbers<[1], [0], [0], [1], [0, 0, 1, 1], [], []>} : vector<256x8xf32>, vector<8x27xf32>, vector<256x27xf32> -> vector<256x27xf32>
    %19 = arith.addf %13, %18 : vector<256x27xf32>
    %c0_14 = arith.constant 0 : index
    %c1_15 = arith.constant 1 : index
    %c0_16 = arith.constant 0 : index
    %c0_17 = arith.constant 0 : index
    %20 = vector.load %arg1[%c0_14, %c1_15, %c0_16, %c0_17] : memref<1x18x18x8xf32, #tpu.memory_space<vmem>>, vector<1x16x16x8xf32>
    %21 = vector.shape_cast %20 : vector<1x16x16x8xf32> to vector<16x16x8xf32>
    %22 = vector.shape_cast %21 : vector<16x16x8xf32> to vector<256x8xf32>
    %23 = vector.extract_strided_slice %0 {offsets = [24, 0], sizes = [8, 27], strides = [1, 1]} : vector<72x27xf32> to vector<8x27xf32>
    %cst_18 = arith.constant dense<0.000000e+00> : vector<256x27xf32>
    %24 = tpu.matmul %22, %23, %cst_18 {dimension_numbers = #tpu.dot_dimension_numbers<[1], [0], [0], [1], [0, 0, 1, 1], [], []>} : vector<256x8xf32>, vector<8x27xf32>, vector<256x27xf32> -> vector<256x27xf32>
    %25 = arith.addf %19, %24 : vector<256x27xf32>
    %c0_19 = arith.constant 0 : index
    %c1_20 = arith.constant 1 : index
    %c1_21 = arith.constant 1 : index
    %c0_22 = arith.constant 0 : index
    %26 = vector.load %arg1[%c0_19, %c1_20, %c1_21, %c0_22] : memref<1x18x18x8xf32, #tpu.memory_space<vmem>>, vector<1x16x16x8xf32>
    %27 = vector.shape_cast %26 : vector<1x16x16x8xf32> to vector<16x16x8xf32>
    %28 = vector.shape_cast %27 : vector<16x16x8xf32> to vector<256x8xf32>
    %29 = vector.extract_strided_slice %0 {offsets = [32, 0], sizes = [8, 27], strides = [1, 1]} : vector<72x27xf32> to vector<8x27xf32>
    %cst_23 = arith.constant dense<0.000000e+00> : vector<256x27xf32>
    %30 = tpu.matmul %28, %29, %cst_23 {dimension_numbers = #tpu.dot_dimension_numbers<[1], [0], [0], [1], [0, 0, 1, 1], [], []>} : vector<256x8xf32>, vector<8x27xf32>, vector<256x27xf32> -> vector<256x27xf32>
    %31 = arith.addf %25, %30 : vector<256x27xf32>
    %c0_24 = arith.constant 0 : index
    %c1_25 = arith.constant 1 : index
    %c2_26 = arith.constant 2 : index
    %c0_27 = arith.constant 0 : index
    %32 = vector.load %arg1[%c0_24, %c1_25, %c2_26, %c0_27] : memref<1x18x18x8xf32, #tpu.memory_space<vmem>>, vector<1x16x16x8xf32>
    %33 = vector.shape_cast %32 : vector<1x16x16x8xf32> to vector<16x16x8xf32>
    %34 = vector.shape_cast %33 : vector<16x16x8xf32> to vector<256x8xf32>
    %35 = vector.extract_strided_slice %0 {offsets = [40, 0], sizes = [8, 27], strides = [1, 1]} : vector<72x27xf32> to vector<8x27xf32>
    %cst_28 = arith.constant dense<0.000000e+00> : vector<256x27xf32>
    %36 = tpu.matmul %34, %35, %cst_28 {dimension_numbers = #tpu.dot_dimension_numbers<[1], [0], [0], [1], [0, 0, 1, 1], [], []>} : vector<256x8xf32>, vector<8x27xf32>, vector<256x27xf32> -> vector<256x27xf32>
    %37 = arith.addf %31, %36 : vector<256x27xf32>
    %c0_29 = arith.constant 0 : index
    %c2_30 = arith.constant 2 : index
    %c0_31 = arith.constant 0 : index
    %c0_32 = arith.constant 0 : index
    %38 = vector.load %arg1[%c0_29, %c2_30, %c0_31, %c0_32] : memref<1x18x18x8xf32, #tpu.memory_space<vmem>>, vector<1x16x16x8xf32>
    %39 = vector.shape_cast %38 : vector<1x16x16x8xf32> to vector<16x16x8xf32>
    %40 = vector.shape_cast %39 : vector<16x16x8xf32> to vector<256x8xf32>
    %41 = vector.extract_strided_slice %0 {offsets = [48, 0], sizes = [8, 27], strides = [1, 1]} : vector<72x27xf32> to vector<8x27xf32>
    %cst_33 = arith.constant dense<0.000000e+00> : vector<256x27xf32>
    %42 = tpu.matmul %40, %41, %cst_33 {dimension_numbers = #tpu.dot_dimension_numbers<[1], [0], [0], [1], [0, 0, 1, 1], [], []>} : vector<256x8xf32>, vector<8x27xf32>, vector<256x27xf32> -> vector<256x27xf32>
    %43 = arith.addf %37, %42 : vector<256x27xf32>
    %c0_34 = arith.constant 0 : index
    %c2_35 = arith.constant 2 : index
    %c1_36 = arith.constant 1 : index
    %c0_37 = arith.constant 0 : index
    %44 = vector.load %arg1[%c0_34, %c2_35, %c1_36, %c0_37] : memref<1x18x18x8xf32, #tpu.memory_space<vmem>>, vector<1x16x16x8xf32>
    %45 = vector.shape_cast %44 : vector<1x16x16x8xf32> to vector<16x16x8xf32>
    %46 = vector.shape_cast %45 : vector<16x16x8xf32> to vector<256x8xf32>
    %47 = vector.extract_strided_slice %0 {offsets = [56, 0], sizes = [8, 27], strides = [1, 1]} : vector<72x27xf32> to vector<8x27xf32>
    %cst_38 = arith.constant dense<0.000000e+00> : vector<256x27xf32>
    %48 = tpu.matmul %46, %47, %cst_38 {dimension_numbers = #tpu.dot_dimension_numbers<[1], [0], [0], [1], [0, 0, 1, 1], [], []>} : vector<256x8xf32>, vector<8x27xf32>, vector<256x27xf32> -> vector<256x27xf32>
    %49 = arith.addf %43, %48 : vector<256x27xf32>
    %c0_39 = arith.constant 0 : index
    %c2_40 = arith.constant 2 : index
    %c2_41 = arith.constant 2 : index
    %c0_42 = arith.constant 0 : index
    %50 = vector.load %arg1[%c0_39, %c2_40, %c2_41, %c0_42] : memref<1x18x18x8xf32, #tpu.memory_space<vmem>>, vector<1x16x16x8xf32>
    %51 = vector.shape_cast %50 : vector<1x16x16x8xf32> to vector<16x16x8xf32>
    %52 = vector.shape_cast %51 : vector<16x16x8xf32> to vector<256x8xf32>
    %53 = vector.extract_strided_slice %0 {offsets = [64, 0], sizes = [8, 27], strides = [1, 1]} : vector<72x27xf32> to vector<8x27xf32>
    %cst_43 = arith.constant dense<0.000000e+00> : vector<256x27xf32>
    %54 = tpu.matmul %52, %53, %cst_43 {dimension_numbers = #tpu.dot_dimension_numbers<[1], [0], [0], [1], [0, 0, 1, 1], [], []>} : vector<256x8xf32>, vector<8x27xf32>, vector<256x27xf32> -> vector<256x27xf32>
    %55 = arith.addf %49, %54 : vector<256x27xf32>
    %c0_44 = arith.constant 0 : index
    %c0_45 = arith.constant 0 : index
    %56 = vector.load %arg3[%c0_44, %c0_45] : memref<1x27xf32, #tpu.memory_space<vmem>>, vector<1x27xf32>
    %57 = vector.broadcast %56 : vector<1x27xf32> to vector<256x27xf32>
    %58 = arith.addf %55, %57 : vector<256x27xf32>
    %59 = tpu.iota {dimensions = array<i32: 1>} : vector<256x27xi32>
    %c18_i32 = arith.constant 18 : i32
    %60 = vector.broadcast %c18_i32 : i32 to vector<256x27xi32>
    %61 = arith.cmpi slt, %59, %60 : vector<256x27xi32>
    %cst_46 = arith.constant 5.000000e-01 : f32
    %62 = vector.broadcast %cst_46 : f32 to vector<256x27xf32>
    %63 = arith.mulf %62, %58 : vector<256x27xf32>
    %64 = math.tanh %63 : vector<256x27xf32>
    %cst_47 = arith.constant 1.000000e+00 : f32
    %65 = vector.broadcast %cst_47 : f32 to vector<256x27xf32>
    %66 = arith.addf %64, %65 : vector<256x27xf32>
    %cst_48 = arith.constant 5.000000e-01 : f32
    %67 = vector.broadcast %cst_48 : f32 to vector<256x27xf32>
    %68 = arith.mulf %67, %66 : vector<256x27xf32>
    %69 = arith.select %61, %58, %68 : vector<256x27xi1>, vector<256x27xf32>
    %c0_49 = arith.constant 0 : index
    %c0_50 = arith.constant 0 : index
    %c0_51 = arith.constant 0 : index
    %70 = vector.load %arg4[%c0_49, %c0_50, %c0_51] : memref<1x256x27xf32, #tpu.memory_space<vmem>>, vector<1x256x27xf32>
    %71 = vector.shape_cast %70 : vector<1x256x27xf32> to vector<256x27xf32>
    %72 = vector.shape_cast %69 : vector<256x27xf32> to vector<1x256x27xf32>
    tpu.vector_store %arg4[%c0_49, %c0_50, %c0_51], %72 {strides = array<i32>} : memref<1x256x27xf32, #tpu.memory_space<vmem>>, vector<1x256x27xf32>,
    return
  }
  func.func @transform_0(%arg0: i32) -> (i32, i32, i32, i32) {
    %c0_i32 = arith.constant 0 : i32
    %c0_i32_0 = arith.constant 0 : i32
    %c0_i32_1 = arith.constant 0 : i32
    %c0_i32_2 = arith.constant 0 : i32
    return %arg0, %c0_i32, %c0_i32_0, %c0_i32_1 : i32, i32, i32, i32
  }
  func.func @transform_1(%arg0: i32) -> (i32, i32) {
    %c0_i32 = arith.constant 0 : i32
    %c0_i32_0 = arith.constant 0 : i32
    %c0_i32_1 = arith.constant 0 : i32
    return %c0_i32, %c0_i32_0 : i32, i32
  }
  func.func @transform_2(%arg0: i32) -> (i32, i32) {
    %c0_i32 = arith.constant 0 : i32
    %c0_i32_0 = arith.constant 0 : i32
    %c0_i32_1 = arith.constant 0 : i32
    return %c0_i32, %c0_i32_0 : i32, i32
  }
  func.func @transform_3(%arg0: i32) -> (i32, i32, i32) {
    %c0_i32 = arith.constant 0 : i32
    %c0_i32_0 = arith.constant 0 : i32
    %c0_i32_1 = arith.constant 0 : i32
    return %arg0, %c0_i32, %c0_i32_0 : i32, i32, i32
  }
}

</mosaic_0001>

<bundles_post_ra>
// kernel: tpu_custom_call.1
= control target key start
LH: loop header
LB: loop body
LE: loop exit
PB: predicated region body
PF: predicated region fallthrough
CT: control target
= control target key end

     0   :  { %s5472_s12 = smov 0   ;;  %s6704_s0 = inlined_call_operand.vmem [shape: f32[2,18,18,8], index: 0, kind: input, shape index: {}]   ;;  %s6705_s1 = inlined_call_operand.vmem [shape: f32[72,27], index: 1, kind: input, shape index: {}]   ;;  %s6706_s2 = inlined_call_operand.vmem [shape: f32[1,27], index: 2, kind: input, shape index: {}]   ;;  %s6707_s3 = inlined_call_operand.vmem [shape: f32[2,256,27], index: 3, kind: output, shape index: {}]  }
   0x1 LB: > { %s3874_s13 = sadd.s32 4294967295, %s5450_s12   ;;  %p3878_p0 = scmp.ge.s32.totalorder %s5450_s12, 1  ;;  %s5450_s12 = sphi %s5472_s12, %s13_s12  }
   0x2   : > { %p137_p1 = scmp.lt.s32.totalorder %s5450_s12, 3 }
   0x4   : > { %p138_p2 = pnand %p3878_p0, %p137_p1 }
   0x6   : > { %141 = sbr.rel (%p138_p2) target bundleno = 541 (0x21d), region = 32 }
   0xd   : > { %v172_v0 = vld [vmem:[%s6705_s1 + $0x8] sm:$0xff]  ;;  %v5486_v1 = vld [vmem:[%s6705_s1 + $0x20] sm:$0xff]  ;;  %p161_p3 = scmp.lt.s32.totalorder %s3874_s13, 1  ;;  %vm244_vm0 = vcmask 64512   ;;  %v177_v9 = vld [vmem:[%s6705_s1 + $0x30] sm:$0xff]  ;;  %vm3786_vm2 = vcmask 220160  }
   0xe   : > { %v171_v2 = vld [vmem:[%s6705_s1] sm:$0xff]  ;;  %4663 = vmatprep.subr.mxu1 %v172_v0  ;;  %4863 = vmatprep.subr.mxu0 %v5486_v1  ;;  %v176_v3 = vld [vmem:[%s6705_s1 + $0x28] sm:$0xff]  ;;  %v5521_v10 = vld [vmem:[%s6705_s1 + $0x10] sm:$0xff] }
   0xf   : > { %4664 = vmatpush3.msra.mxu1 %v172_v0  ;;  %4864 = vmatpush3.msra.mxu0 %v5486_v1  ;;  %s6818_s13 = smov (!%p161_p3, %s3874_s13), 1  ;;  %v5636_v28 = vld [vmem:[%s6705_s1 + $0x38] sm:$0xff] }
  0x10   : > { %4713 = vmatprep.subr.mxu1 %v171_v2  ;;  %4913 = vmatprep.subr.mxu0 %v176_v3  ;;  %s5371_s22 = smul.u32 432, %s6818_s13  ;;  %v5797_v61 = vld [vmem:[%s6705_s1 + $0x18] sm:$0xff]  ;;  %s4365_s11 = sshll.u32 %s6818_s13, 8 }
  0x11   : > { %s6449_s13 = scalar_lea.vmem %s6707_s3, %s4365_s11 }
  0x12   : > { %s5502_s25 = scalar_lea.vmem %s6704_s0, %s5371_s22 }
  0x13   : > { %v212_v4 = vld [vmem:[%s5502_s25 + $0x1] sm:$0xff]  ;;  %v4042_v5 = vld [vmem:[%s5502_s25 + $0x19] sm:$0xff]  ;;  %v213_v6 = vld [vmem:[%s5502_s25 + $0x9] sm:$0xff] }
  0x14   : > { %4665 = vmatprep.mubr.msk.f32.mxu1 %vm244_vm0, %v212_v4  ;;  %4865 = vmatprep.mubr.msk.f32.mxu0 %vm244_vm0, %v4042_v5  ;;  %v4043_v7 = vld [vmem:[%s5502_s25 + $0x21] sm:$0xff]  ;;  %v5511_v8 = vld [vmem:[%s5502_s25 + $0x31] sm:$0xff]  ;;  %v5524_v11 = vld [vmem:[%s5502_s25 + $0x39] sm:$0xff] }
  0x15   : > { %4666 = vmatmul.mubr.msk.f32.vlgmr.msra.gmra.mrb[0].mxu1 %vm244_vm0, %v213_v6  ;;  %4866 = vmatmul.mubr.msk.f32.vlgmr.msra.gmra.mrb[0].mxu0 %vm244_vm0, %v4043_v7  ;;  %v5530_v12 = vld [vmem:[%s5502_s25 + $0x49] sm:$0xff]  ;;  %v5541_v13 = vld [vmem:[%s5502_s25 + $0x51] sm:$0xff]  ;;  %v5544_v14 = vld [vmem:[%s5502_s25 + $0x61] sm:$0xff] }
  0x16   : > { %4714 = vmatpush3.msra.mxu1 %v171_v2  ;;  %4914 = vmatpush3.msra.mxu0 %v176_v3  ;;  %v5555_v15 = vld [vmem:[%s5502_s25 + $0x69] sm:$0xff]  ;;  %v5558_v16 = vld [vmem:[%s5502_s25 + $0x79] sm:$0xff]  ;;  %v5569_v17 = vld [vmem:[%s5502_s25 + $0x81] sm:$0xff] }
  0x17   : > { %4668 = vmatprep.mubr.msk.f32.mxu1 %vm244_vm0, %v4042_v5  ;;  %4868 = vmatprep.mubr.msk.f32.mxu0 %vm244_vm0, %v5511_v8  ;;  %v5572_v18 = vld [vmem:[%s5502_s25 + $0x91] sm:$0xff]  ;;  %v5583_v19 = vld [vmem:[%s5502_s25 + $0x99] sm:$0xff]  ;;  %v5586_v20 = vld [vmem:[%s5502_s25 + $0xa9] sm:$0xff] }
  0x18   : > { %4963 = vmatprep.subr.mxu0 %v177_v9  ;;  %4763 = vmatprep.subr.mxu1 %v5521_v10  ;;  %v5597_v21 = vld [vmem:[%s5502_s25 + $0xb1] sm:$0xff]  ;;  %v5600_v22 = vld [vmem:[%s5502_s25 + $0xc1] sm:$0xff]  ;;  %v5611_v23 = vld [vmem:[%s5502_s25 + $0xc9] sm:$0xff] }
  0x19   : > { %4669 = vmatmul.mubr.msk.f32.gmra.mrb[2].mxu1 %vm244_vm0, %v4043_v7  ;;  %4869 = vmatmul.mubr.msk.f32.gmra.mrb[2].mxu0 %vm244_vm0, %v5524_v11  ;;  %v5614_v24 = vld [vmem:[%s5502_s25 + $0x1a] sm:$0xff]  ;;  %v5625_v25 = vld [vmem:[%s5502_s25 + $0x22] sm:$0xff]  ;;  %v5631_v27 = vld [vmem:[%s5502_s25 + $0x32] sm:$0xff] }
  0x1a   : > { %4671 = vmatprep.mubr.msk.f32.mxu1 %vm244_vm0, %v5511_v8  ;;  %4871 = vmatprep.mubr.msk.f32.mxu0 %vm244_vm0, %v5530_v12  ;;  %v5628_v26 = vld [vmem:[%s5502_s25 + $0xd9] sm:$0xff]  ;;  %v5645_v29 = vld [vmem:[%s5502_s25 + $0xe1] sm:$0xff]  ;;  %v5653_v31 = vld [vmem:[%s5502_s25 + $0xf1] sm:$0xff] }
  0x1b   : > { %6753 = vst [vmem:[#allocation2_spill] sm:$0xff] %v5645_v29  ;;  %v5648_v30 = vld [vmem:[%s5502_s25 + $0x3a] sm:$0xff]  ;;  %6754 = vst [vmem:[#allocation3_spill] sm:$0xff] %v5653_v31  ;;  %v5656_v32 = vld [vmem:[%s5502_s25 + $0x4a] sm:$0xff] }
  0x1c   : > { %v5668_v33 = vld [vmem:[%s5502_s25 + $0xf9] sm:$0xff]  ;;  %v5674_v35 = vld [vmem:[%s5502_s25 + $0x109] sm:$0xff]  ;;  %v5688_v37 = vld [vmem:[%s5502_s25 + $0x111] sm:$0xff] }
  0x1d   : > { %4672 = vmatmul.mubr.msk.f32.gmra.mrb[4].mxu1 %vm244_vm0, %v5524_v11  ;;  %4872 = vmatmul.mubr.msk.f32.gmra.mrb[4].mxu0 %vm244_vm0, %v5541_v13  ;;  %6755 = vst [vmem:[#allocation4_spill] sm:$0xff] %v5668_v33  ;;  %v5671_v34 = vld [vmem:[%s5502_s25 + $0x52] sm:$0xff]  ;;  %6756 = vst [vmem:[#allocation5_spill] sm:$0xff] %v5674_v35  ;;  %v5677_v36 = vld [vmem:[%s5502_s25 + $0x62] sm:$0xff] }
  0x1e   : > { %4674 = vmatprep.mubr.msk.f32.mxu1 %vm244_vm0, %v5530_v12  ;;  %4874 = vmatprep.mubr.msk.f32.mxu0 %vm244_vm0, %v5544_v14  ;;  %6757 = vst [vmem:[#allocation6_spill] sm:$0xff] %v5688_v37  ;;  %v5691_v38 = vld [vmem:[%s5502_s25 + $0x6a] sm:$0xff]  ;;  %v5694_v39 = vld [vmem:[%s5502_s25 + $0x121] sm:$0xff]  ;;  %v5714_v43 = vld [vmem:[%s5502_s25 + $0x139] sm:$0xff] }
  0x1f   : > { %6758 = vst [vmem:[#allocation7_spill] sm:$0xff] %v5694_v39  ;;  %v5697_v40 = vld [vmem:[%s5502_s25 + $0x7a] sm:$0xff]  ;;  %v5708_v41 = vld [vmem:[%s5502_s25 + $0x129] sm:$0xff]  ;;  %6760 = vst [vmem:[#allocation9_spill] sm:$0xff] %v5714_v43 }
  0x20   : > { %6759 = vst [vmem:[#allocation8_spill] sm:$0xff] %v5708_v41  ;;  %v5711_v42 = vld [vmem:[%s5502_s25 + $0x82] sm:$0xff]  ;;  %v5717_v44 = vld [vmem:[%s5502_s25 + $0x92] sm:$0xff]  ;;  %v5731_v46 = vld [vmem:[%s5502_s25 + $0x9a] sm:$0xff] }
  0x21   : > { %4675 = vmatmul.mubr.msk.f32.gmra.mrb[6].mxu1 %vm244_vm0, %v5541_v13  ;;  %4875 = vmatmul.mubr.msk.f32.gmra.mrb[6].mxu0 %vm244_vm0, %v5555_v15  ;;  %v5728_v45 = vld [vmem:[%s5502_s25 + $0x141] sm:$0xff]  ;;  %v5734_v47 = vld [vmem:[%s5502_s25 + $0x151] sm:$0xff]  ;;  %v5748_v49 = vld [vmem:[%s5502_s25 + $0x159] sm:$0xff] }
  0x22   : > { %4677 = vmatprep.mubr.msk.f32.mxu1 %vm244_vm0, %v5544_v14  ;;  %4877 = vmatprep.mubr.msk.f32.mxu0 %vm244_vm0, %v5558_v16  ;;  %6761 = vst [vmem:[#allocation10_spill] sm:$0xff] %v5728_v45  ;;  %6762 = vst [vmem:[#allocation11_spill] sm:$0xff] %v5734_v47  ;;  %v5737_v48 = vld [vmem:[%s5502_s25 + $0xaa] sm:$0xff]  ;;  %v5751_v50 = vld [vmem:[%s5502_s25 + $0xb2] sm:$0xff] }
  0x23   : > { %6763 = vst [vmem:[#allocation12_spill] sm:$0xff] %v5748_v49  ;;  %v5754_v51 = vld [vmem:[%s5502_s25 + $0x169] sm:$0xff]  ;;  %v5768_v53 = vld [vmem:[%s5502_s25 + $0x171] sm:$0xff]  ;;  %v180_v55 = vld [vmem:[%s5502_s25] sm:$0xff] }
  0x24   : > { %6764 = vst [vmem:[#allocation13_spill] sm:$0xff] %v5754_v51  ;;  %v5757_v52 = vld [vmem:[%s5502_s25 + $0xc2] sm:$0xff]  ;;  %6765 = vst [vmem:[#allocation14_spill] sm:$0xff] %v5768_v53  ;;  %v5771_v54 = vld [vmem:[%s5502_s25 + $0xca] sm:$0xff] }
  0x25   : > { %4678 = vmatmul.mubr.msk.f32.gmra.mrb[8].mxu1 %vm244_vm0, %v5555_v15  ;;  %4878 = vmatmul.mubr.msk.f32.gmra.mrb[8].mxu0 %vm244_vm0, %v5569_v17  ;;  %v5775_v56 = vld [vmem:[%s5502_s25 + $0xda] sm:$0xff]  ;;  %v181_v57 = vld [vmem:[%s5502_s25 + $0x8] sm:$0xff]  ;;  %v5792_v60 = vld [vmem:[%s5502_s25 + $0xf2] sm:$0xff] }
  0x26   : > { %4680 = vmatprep.mubr.msk.f32.mxu1 %vm244_vm0, %v5558_v16  ;;  %4880 = vmatprep.mubr.msk.f32.mxu0 %vm244_vm0, %v5572_v18  ;;  %v5786_v58 = vld [vmem:[%s5502_s25 + $0xe2] sm:$0xff]  ;;  %v5789_v59 = vld [vmem:[%s5502_s25 + $0x18] sm:$0xff]  ;;  %v5814_v0 = vld [vmem:[%s5502_s25 + $0x30] sm:$0xff] }
  0x27   : > { %6766 = vst [vmem:[#allocation15_spill] sm:$0xff] %v5789_v59  ;;  %v5806_v62 = vld [vmem:[%s5502_s25 + $0x20] sm:$0xff]  ;;  %6768 = vst [vmem:[#allocation17_spill] sm:$0xff] %v5814_v0  ;;  %v5817_v2 = vld [vmem:[%s5502_s25 + $0x10a] sm:$0xff] }
  0x28   : > { %6767 = vst [vmem:[#allocation16_spill] sm:$0xff] %v5806_v62  ;;  %v5809_v63 = vld [vmem:[%s5502_s25 + $0xfa] sm:$0xff]  ;;  %v5832_v4 = vld [vmem:[%s5502_s25 + $0x112] sm:$0xff]  ;;  %v5835_v5 = vld [vmem:[%s5502_s25 + $0x48] sm:$0xff] }
  0x29   : > { %4681 = vmatmul.mubr.msk.f32.gmra.mrb[10].mxu1 %vm244_vm0, %v5569_v17  ;;  %4881 = vmatmul.mubr.msk.f32.gmra.mrb[10].mxu0 %vm244_vm0, %v5583_v19  ;;  %v5829_v3 = vld [vmem:[%s5502_s25 + $0x38] sm:$0xff]  ;;  %6770 = vst [vmem:[#allocation19_spill] sm:$0xff] %v5835_v5  ;;  %v5838_v6 = vld [vmem:[%s5502_s25 + $0x122] sm:$0xff]  ;;  %v5849_v7 = vld [vmem:[%s5502_s25 + $0x50] sm:$0xff] }
  0x2a   : > { %4683 = vmatprep.mubr.msk.f32.mxu1 %vm244_vm0, %v5572_v18  ;;  %4883 = vmatprep.mubr.msk.f32.mxu0 %vm244_vm0, %v5586_v20  ;;  %6769 = vst [vmem:[#allocation18_spill] sm:$0xff] %v5829_v3  ;;  %6771 = vst [vmem:[#allocation20_spill] sm:$0xff] %v5849_v7 }
  0x2d   : > { %4684 = vmatmul.mubr.msk.f32.gmra.mrb[12].mxu1 %vm244_vm0, %v5583_v19  ;;  %4884 = vmatmul.mubr.msk.f32.gmra.mrb[12].mxu0 %vm244_vm0, %v5597_v21 }
  0x2e   : > { %4686 = vmatprep.mubr.msk.f32.mxu1 %vm244_vm0, %v5586_v20  ;;  %4886 = vmatprep.mubr.msk.f32.mxu0 %vm244_vm0, %v5600_v22 }
  0x31   : > { %4687 = vmatmul.mubr.msk.f32.gmra.mrb[14].mxu1 %vm244_vm0, %v5597_v21  ;;  %4887 = vmatmul.mubr.msk.f32.gmra.mrb[14].mxu0 %vm244_vm0, %v5611_v23 }
  0x32   : > { %4689 = vmatprep.mubr.msk.f32.mxu1 %vm244_vm0, %v5600_v22  ;;  %4915 = vmatprep.mubr.msk.f32.mxu0 %vm244_vm0, %v5614_v24 }
  0x35   : > { %4690 = vmatmul.mubr.msk.f32.gmra.mrb[16].mxu1 %vm244_vm0, %v5611_v23  ;;  %4916 = vmatmul.mubr.msk.f32.vlgmr.msra.gmra.mrb[0].mxu0 %vm244_vm0, %v5625_v25 }
  0x36   : > { %4964 = vmatpush3.msra.mxu0 %v177_v9  ;;  %4692 = vmatprep.mubr.msk.f32.mxu1 %vm244_vm0, %v5628_v26  ;;  %v5852_v9 = vld [vmem:[%s5502_s25 + $0x12a] sm:$0xff] }
  0x37   : > { %4918 = vmatprep.mubr.msk.f32.mxu0 %vm244_vm0, %v5631_v27  ;;  %5013 = vmatprep.subr.mxu0 %v5636_v28 }
  0x39   : > { %4693 = vmatmul.mubr.msk.f32.gmra.mrb[18].mxu1 %vm244_vm0, %v5645_v29  ;;  %4919 = vmatmul.mubr.msk.f32.gmra.mrb[2].mxu0 %vm244_vm0, %v5648_v30  ;;  %v5949_v29 = vld [vmem:[%s5502_s25 + $0xd8] sm:$0xff] }
  0x3a   : > { %4695 = vmatprep.mubr.msk.f32.mxu1 %vm244_vm0, %v5653_v31  ;;  %4921 = vmatprep.mubr.msk.f32.mxu0 %vm244_vm0, %v5656_v32  ;;  %v5932_v31 = vld [vmem:[%s5502_s25 + $0x18a] sm:$0xff] }
  0x3b   : > { %6782 = vst [vmem:[#allocation31_spill] sm:$0xff] %v5932_v31 }
  0x3d   : > { %4696 = vmatmul.mubr.msk.f32.gmra.mrb[20].mxu1 %vm244_vm0, %v5668_v33  ;;  %4922 = vmatmul.mubr.msk.f32.gmra.mrb[4].mxu0 %vm244_vm0, %v5671_v34  ;;  %v5918_v33 = vld [vmem:[%s5502_s25 + $0x182] sm:$0xff] }
  0x3e   : > { %4698 = vmatprep.mubr.msk.f32.mxu1 %vm244_vm0, %v5674_v35  ;;  %4924 = vmatprep.mubr.msk.f32.mxu0 %vm244_vm0, %v5677_v36  ;;  %v5915_v35 = vld [vmem:[%s5502_s25 + $0xa8] sm:$0xff]  ;;  %6780 = vst [vmem:[#allocation29_spill] sm:$0xff] %v5918_v33 }
  0x3f   : > { %6779 = vst [vmem:[#allocation28_spill] sm:$0xff] %v5915_v35 }
  0x41   : > { %4699 = vmatmul.mubr.msk.f32.gmra.mrb[22].mxu1 %vm244_vm0, %v5688_v37  ;;  %4925 = vmatmul.mubr.msk.f32.gmra.mrb[6].mxu0 %vm244_vm0, %v5691_v38  ;;  %v5912_v37 = vld [vmem:[%s5502_s25 + $0x172] sm:$0xff] }
  0x42   : > { %4701 = vmatprep.mubr.msk.f32.mxu1 %vm244_vm0, %v5694_v39  ;;  %4927 = vmatprep.mubr.msk.f32.mxu0 %vm244_vm0, %v5697_v40  ;;  %v5909_v39 = vld [vmem:[%s5502_s25 + $0x98] sm:$0xff]  ;;  %6778 = vst [vmem:[#allocation27_spill] sm:$0xff] %v5912_v37 }
  0x43   : > { %6777 = vst [vmem:[#allocation26_spill] sm:$0xff] %v5909_v39 }
  0x45   : > { %4702 = vmatmul.mubr.msk.f32.gmra.mrb[24].mxu1 %vm244_vm0, %v5708_v41  ;;  %4928 = vmatmul.mubr.msk.f32.gmra.mrb[8].mxu0 %vm244_vm0, %v5711_v42  ;;  %v5898_v41 = vld [vmem:[%s5502_s25 + $0x16a] sm:$0xff] }
  0x46   : > { %4704 = vmatprep.mubr.msk.f32.mxu1 %vm244_vm0, %v5714_v43  ;;  %4930 = vmatprep.mubr.msk.f32.mxu0 %vm244_vm0, %v5717_v44  ;;  %v5895_v43 = vld [vmem:[%s5502_s25 + $0x90] sm:$0xff] }
  0x47   : > { %6776 = vst [vmem:[#allocation25_spill] sm:$0xff] %v5895_v43 }
  0x49   : > { %4705 = vmatmul.mubr.msk.f32.gmra.mrb[26].mxu1 %vm244_vm0, %v5728_v45  ;;  %4931 = vmatmul.mubr.msk.f32.gmra.mrb[10].mxu0 %vm244_vm0, %v5731_v46  ;;  %v5892_v45 = vld [vmem:[%s5502_s25 + $0x15a] sm:$0xff] }
  0x4a   : > { %4707 = vmatprep.mubr.msk.f32.mxu1 %vm244_vm0, %v5734_v47  ;;  %4933 = vmatprep.mubr.msk.f32.mxu0 %vm244_vm0, %v5737_v48  ;;  %v5889_v47 = vld [vmem:[%s5502_s25 + $0x80] sm:$0xff] }
  0x4b   : > { %6775 = vst [vmem:[#allocation24_spill] sm:$0xff] %v5889_v47 }
  0x4d   : > { %4708 = vmatmul.mubr.msk.f32.gmra.mrb[28].mxu1 %vm244_vm0, %v5748_v49  ;;  %4934 = vmatmul.mubr.msk.f32.gmra.mrb[12].mxu0 %vm244_vm0, %v5751_v50  ;;  %v5878_v49 = vld [vmem:[%s5502_s25 + $0x152] sm:$0xff] }
  0x4e   : > { %4710 = vmatprep.mubr.msk.f32.mxu1 %vm244_vm0, %v5754_v51  ;;  %4936 = vmatprep.mubr.msk.f32.mxu0 %vm244_vm0, %v5757_v52  ;;  %v5875_v51 = vld [vmem:[%s5502_s25 + $0x78] sm:$0xff] }
  0x4f   : > { %6774 = vst [vmem:[#allocation23_spill] sm:$0xff] %v5875_v51 }
  0x51   : > { %4711 = vmatmul.mubr.msk.f32.gmra.mrb[30].mxu1 %vm244_vm0, %v5768_v53  ;;  %4937 = vmatmul.mubr.msk.f32.gmra.mrb[14].mxu0 %vm244_vm0, %v5771_v54  ;;  %v5872_v53 = vld [vmem:[%s5502_s25 + $0x142] sm:$0xff] }
  0x52   : > { %4715 = vmatprep.mubr.msk.f32.mxu1 %vm244_vm0, %v180_v55  ;;  %4939 = vmatprep.mubr.msk.f32.mxu0 %vm244_vm0, %v5775_v56  ;;  %v5858_v55 = vld [vmem:[%s5502_s25 + $0x13a] sm:$0xff] }
  0x55   : > { %4716 = vmatmul.mubr.msk.f32.vlgmr.msra.gmra.mrb[0].mxu1 %vm244_vm0, %v181_v57  ;;  %4940 = vmatmul.mubr.msk.f32.gmra.mrb[16].mxu0 %vm244_vm0, %v5786_v58  ;;  %v5869_v57 = vld [vmem:[%s5502_s25 + $0x68] sm:$0xff] }
  0x56   : > { %4764 = vmatpush3.msra.mxu1 %v5521_v10  ;;  %4718 = vmatprep.mubr.msk.f32.mxu1 %vm244_vm0, %v5789_v59  ;;  %v5855_v10 = vld [vmem:[%s5502_s25 + $0x60] sm:$0xff]  ;;  %6773 = vst [vmem:[#allocation22_spill] sm:$0xff] %v5869_v57 }
  0x57   : > { %4942 = vmatprep.mubr.msk.f32.mxu0 %vm244_vm0, %v5792_v60  ;;  %4813 = vmatprep.subr.mxu1 %v5797_v61  ;;  %6772 = vst [vmem:[#allocation21_spill] sm:$0xff] %v5855_v10  ;;  %v5935_v59 = vld [vmem:[%s5502_s25 + $0xc0] sm:$0xff] }
  0x59   : > { %4719 = vmatmul.mubr.msk.f32.gmra.mrb[2].mxu1 %vm244_vm0, %v5806_v62  ;;  %4943 = vmatmul.mubr.msk.f32.gmra.mrb[18].mxu0 %vm244_vm0, %v5809_v63  ;;  %v5929_v62 = vld [vmem:[%s5502_s25 + $0xb0] sm:$0xff] }
  0x5a   : > { %4721 = vmatprep.mubr.msk.f32.mxu1 %vm244_vm0, %v5814_v0  ;;  %4945 = vmatprep.mubr.msk.f32.mxu0 %vm244_vm0, %v5817_v2  ;;  %6781 = vst [vmem:[#allocation30_spill] sm:$0xff] %v5929_v62 }
  0x5d   : > { %4722 = vmatmul.mubr.msk.f32.gmra.mrb[4].mxu1 %vm244_vm0, %v5829_v3  ;;  %4946 = vmatmul.mubr.msk.f32.gmra.mrb[20].mxu0 %vm244_vm0, %v5832_v4 }
  0x5e   : > { %4724 = vmatprep.mubr.msk.f32.mxu1 %vm244_vm0, %v5835_v5  ;;  %4948 = vmatprep.mubr.msk.f32.mxu0 %vm244_vm0, %v5838_v6 }
  0x61   : > { %4725 = vmatmul.mubr.msk.f32.gmra.mrb[6].mxu1 %vm244_vm0, %v5849_v7  ;;  %4949 = vmatmul.mubr.msk.f32.gmra.mrb[22].mxu0 %vm244_vm0, %v5852_v9 }
  0x62   : > { %4727 = vmatprep.mubr.msk.f32.mxu1 %vm244_vm0, %v5855_v10  ;;  %4951 = vmatprep.mubr.msk.f32.mxu0 %vm244_vm0, %v5858_v55 }
  0x65   : > { %4728 = vmatmul.mubr.msk.f32.gmra.mrb[8].mxu1 %vm244_vm0, %v5869_v57  ;;  %4952 = vmatmul.mubr.msk.f32.gmra.mrb[24].mxu0 %vm244_vm0, %v5872_v53 }
  0x66   : > { %4730 = vmatprep.mubr.msk.f32.mxu1 %vm244_vm0, %v5875_v51  ;;  %4954 = vmatprep.mubr.msk.f32.mxu0 %vm244_vm0, %v5878_v49 }
  0x69   : > { %4731 = vmatmul.mubr.msk.f32.gmra.mrb[10].mxu1 %vm244_vm0, %v5889_v47  ;;  %4955 = vmatmul.mubr.msk.f32.gmra.mrb[26].mxu0 %vm244_vm0, %v5892_v45 }
  0x6a   : > { %4733 = vmatprep.mubr.msk.f32.mxu1 %vm244_vm0, %v5895_v43  ;;  %4957 = vmatprep.mubr.msk.f32.mxu0 %vm244_vm0, %v5898_v41 }
  0x6d   : > { %4734 = vmatmul.mubr.msk.f32.gmra.mrb[12].mxu1 %vm244_vm0, %v5909_v39  ;;  %4958 = vmatmul.mubr.msk.f32.gmra.mrb[28].mxu0 %vm244_vm0, %v5912_v37  ;;  %v5954_v37 = vld [vmem:[%s6705_s1 + $0x40] sm:$0xff] }
  0x6e   : > { %4736 = vmatprep.mubr.msk.f32.mxu1 %vm244_vm0, %v5915_v35  ;;  %4960 = vmatprep.mubr.msk.f32.mxu0 %vm244_vm0, %v5918_v33  ;;  %v5946_v33 = vld [vmem:[%s5502_s25 + $0xc8] sm:$0xff] }
  0x6f   : > { %6783 = vst [vmem:[#allocation32_spill] sm:$0xff] %v5946_v33 }
  0x71   : > { %4737 = vmatmul.mubr.msk.f32.gmra.mrb[14].mxu1 %vm244_vm0, %v5929_v62  ;;  %4961 = vmatmul.mubr.msk.f32.gmra.mrb[30].mxu0 %vm244_vm0, %v5932_v31  ;;  %v5964_v31 = vld [vmem:[%s5502_s25 + $0xe0] sm:$0xff] }
  0x72   : > { %4739 = vmatprep.mubr.msk.f32.mxu1 %vm244_vm0, %v5935_v59  ;;  %4965 = vmatprep.mubr.msk.f32.mxu0 %vm244_vm0, %v5814_v0  ;;  %v5969_v0 = vld [vmem:[%s5502_s25 + $0xf0] sm:$0xff] }
  0x75   : > { %4740 = vmatmul.mubr.msk.f32.gmra.mrb[16].mxu1 %vm244_vm0, %v5946_v33  ;;  %4966 = vmatmul.mubr.msk.f32.vlgmr.msra.gmra.mrb[0].mxu0 %vm244_vm0, %v5829_v3  ;;  %v887_v3 = vld [vmem:[%s5502_s25 + $0x2] sm:$0xff] }
  0x76   : > { %5014 = vmatpush3.msra.mxu0 %v5636_v28  ;;  %4742 = vmatprep.mubr.msk.f32.mxu1 %vm244_vm0, %v5949_v29  ;;  %v5981_v28 = vld [vmem:[%s5502_s25 + $0xf8] sm:$0xff] }
  0x77   : > { %4968 = vmatprep.mubr.msk.f32.mxu0 %vm244_vm0, %v5835_v5  ;;  %5063 = vmatprep.subr.mxu0 %v5954_v37  ;;  %v5984_v5 = vld [vmem:[%s5502_s25 + $0x108] sm:$0xff] }
  0x79   : > { %4743 = vmatmul.mubr.msk.f32.gmra.mrb[18].mxu1 %vm244_vm0, %v5964_v31  ;;  %4969 = vmatmul.mubr.msk.f32.gmra.mrb[2].mxu0 %vm244_vm0, %v5849_v7  ;;  %v5995_v7 = vld [vmem:[%s5502_s25 + $0x110] sm:$0xff] }
  0x7a   : > { %4745 = vmatprep.mubr.msk.f32.mxu1 %vm244_vm0, %v5969_v0  ;;  %4971 = vmatprep.mubr.msk.f32.mxu0 %vm244_vm0, %v5855_v10  ;;  %v5998_v10 = vld [vmem:[%s5502_s25 + $0x120] sm:$0xff] }
  0x7d   : > { %4746 = vmatmul.mubr.msk.f32.gmra.mrb[20].mxu1 %vm244_vm0, %v5981_v28  ;;  %4972 = vmatmul.mubr.msk.f32.gmra.mrb[4].mxu0 %vm244_vm0, %v5869_v57  ;;  %v6009_v57 = vld [vmem:[%s5502_s25 + $0x128] sm:$0xff] }
  0x7e   : > { %4748 = vmatprep.mubr.msk.f32.mxu1 %vm244_vm0, %v5984_v5  ;;  %4974 = vmatprep.mubr.msk.f32.mxu0 %vm244_vm0, %v5875_v51  ;;  %v6012_v51 = vld [vmem:[%s5502_s25 + $0x138] sm:$0xff] }
  0x81   : > { %4749 = vmatmul.mubr.msk.f32.gmra.mrb[22].mxu1 %vm244_vm0, %v5995_v7  ;;  %4975 = vmatmul.mubr.msk.f32.gmra.mrb[6].mxu0 %vm244_vm0, %v5889_v47  ;;  %v6023_v47 = vld [vmem:[%s5502_s25 + $0x140] sm:$0xff] }
  0x82   : > { %4751 = vmatprep.mubr.msk.f32.mxu1 %vm244_vm0, %v5998_v10  ;;  %4977 = vmatprep.mubr.msk.f32.mxu0 %vm244_vm0, %v5895_v43  ;;  %v6026_v43 = vld [vmem:[%s5502_s25 + $0x150] sm:$0xff] }
  0x85   : > { %4752 = vmatmul.mubr.msk.f32.gmra.mrb[24].mxu1 %vm244_vm0, %v6009_v57  ;;  %4978 = vmatmul.mubr.msk.f32.gmra.mrb[8].mxu0 %vm244_vm0, %v5909_v39  ;;  %v6037_v39 = vld [vmem:[%s5502_s25 + $0x158] sm:$0xff] }
  0x86   : > { %4754 = vmatprep.mubr.msk.f32.mxu1 %vm244_vm0, %v6012_v51  ;;  %4980 = vmatprep.mubr.msk.f32.mxu0 %vm244_vm0, %v5915_v35  ;;  %v6040_v35 = vld [vmem:[%s5502_s25 + $0x168] sm:$0xff] }
  0x89   : > { %4755 = vmatmul.mubr.msk.f32.gmra.mrb[26].mxu1 %vm244_vm0, %v6023_v47  ;;  %4981 = vmatmul.mubr.msk.f32.gmra.mrb[10].mxu0 %vm244_vm0, %v5929_v62  ;;  %v6051_v62 = vld [vmem:[%s5502_s25 + $0x170] sm:$0xff] }
  0x8a   : > { %4757 = vmatprep.mubr.msk.f32.mxu1 %vm244_vm0, %v6026_v43  ;;  %4983 = vmatprep.mubr.msk.f32.mxu0 %vm244_vm0, %v5935_v59 }
  0x8d   : > { %4758 = vmatmul.mubr.msk.f32.gmra.mrb[28].mxu1 %vm244_vm0, %v6037_v39  ;;  %4984 = vmatmul.mubr.msk.f32.gmra.mrb[12].mxu0 %vm244_vm0, %v5946_v33  ;;  %v888_v33 = vld [vmem:[%s5502_s25 + $0xa] sm:$0xff] }
  0x8e   : > { %4760 = vmatprep.mubr.msk.f32.mxu1 %vm244_vm0, %v6040_v35  ;;  %4986 = vmatprep.mubr.msk.f32.mxu0 %vm244_vm0, %v5949_v29 }
  0x91   : > { %4761 = vmatmul.mubr.msk.f32.gmra.mrb[30].mxu1 %vm244_vm0, %v6051_v62  ;;  %4987 = vmatmul.mubr.msk.f32.gmra.mrb[14].mxu0 %vm244_vm0, %v5964_v31 }
  0x92   : > { %4765 = vmatprep.mubr.msk.f32.mxu1 %vm244_vm0, %v887_v3  ;;  %4989 = vmatprep.mubr.msk.f32.mxu0 %vm244_vm0, %v5969_v0  ;;  %v6800_v3 = vld [vmem:[#allocation22_spill] sm:$0xff] }
  0x95   : > { %4766 = vmatmul.mubr.msk.f32.vlgmr.msra.gmra.mrb[0].mxu1 %vm244_vm0, %v888_v33  ;;  %4990 = vmatmul.mubr.msk.f32.gmra.mrb[16].mxu0 %vm244_vm0, %v5981_v28  ;;  %v4200_v33 = vld [vmem:[%s5502_s25 + $0x198] sm:$0xff] }
  0x96   : > { %4814 = vmatpush3.msra.mxu1 %v5797_v61  ;;  %4768 = vmatprep.mubr.msk.f32.mxu1 %vm244_vm0, %v5614_v24  ;;  %v6104_v24 = vld [vmem:[%s5502_s25 + $0x180] sm:$0xff] }
  0x97   : > { %4992 = vmatprep.mubr.msk.f32.mxu0 %vm244_vm0, %v5984_v5  ;;  %5113 = vmatprep.subr.mxu1 %v5486_v1  ;;  %v4201_v61 = vld [vmem:[%s5502_s25 + $0x1a0] sm:$0xff] }
  0x99   : > { %4769 = vmatmul.mubr.msk.f32.gmra.mrb[2].mxu1 %vm244_vm0, %v5625_v25  ;;  %4993 = vmatmul.mubr.msk.f32.gmra.mrb[18].mxu0 %vm244_vm0, %v5995_v7  ;;  %v6115_v25 = vld [vmem:[%s5502_s25 + $0x188] sm:$0xff] }
  0x9a   : > { %4771 = vmatprep.mubr.msk.f32.mxu1 %vm244_vm0, %v5631_v27  ;;  %4995 = vmatprep.mubr.msk.f32.mxu0 %vm244_vm0, %v5998_v10 }
  0x9d   : > { %4772 = vmatmul.mubr.msk.f32.gmra.mrb[4].mxu1 %vm244_vm0, %v5648_v30  ;;  %4996 = vmatmul.mubr.msk.f32.gmra.mrb[20].mxu0 %vm244_vm0, %v6009_v57 }
  0x9e   : > { %4774 = vmatprep.mubr.msk.f32.mxu1 %vm244_vm0, %v5656_v32  ;;  %4998 = vmatprep.mubr.msk.f32.mxu0 %vm244_vm0, %v6012_v51 }
  0xa1   : > { %4775 = vmatmul.mubr.msk.f32.gmra.mrb[6].mxu1 %vm244_vm0, %v5671_v34  ;;  %4999 = vmatmul.mubr.msk.f32.gmra.mrb[22].mxu0 %vm244_vm0, %v6023_v47 }
  0xa2   : > { %4777 = vmatprep.mubr.msk.f32.mxu1 %vm244_vm0, %v5677_v36  ;;  %5001 = vmatprep.mubr.msk.f32.mxu0 %vm244_vm0, %v6026_v43 }
  0xa5   : > { %4778 = vmatmul.mubr.msk.f32.gmra.mrb[8].mxu1 %vm244_vm0, %v5691_v38  ;;  %5002 = vmatmul.mubr.msk.f32.gmra.mrb[24].mxu0 %vm244_vm0, %v6037_v39 }
  0xa6   : > { %4780 = vmatprep.mubr.msk.f32.mxu1 %vm244_vm0, %v5697_v40  ;;  %5004 = vmatprep.mubr.msk.f32.mxu0 %vm244_vm0, %v6040_v35 }
  0xa9   : > { %4781 = vmatmul.mubr.msk.f32.gmra.mrb[10].mxu1 %vm244_vm0, %v5711_v42  ;;  %5005 = vmatmul.mubr.msk.f32.gmra.mrb[26].mxu0 %vm244_vm0, %v6051_v62 }
  0xaa   : > { %4783 = vmatprep.mubr.msk.f32.mxu1 %vm244_vm0, %v5717_v44  ;;  %5007 = vmatprep.mubr.msk.f32.mxu0 %vm244_vm0, %v6104_v24 }
  0xad   : > { %4784 = vmatmul.mubr.msk.f32.gmra.mrb[12].mxu1 %vm244_vm0, %v5731_v46  ;;  %5008 = vmatmul.mubr.msk.f32.gmra.mrb[28].mxu0 %vm244_vm0, %v6115_v25 }
  0xae   : > { %4786 = vmatprep.mubr.msk.f32.mxu1 %vm244_vm0, %v5737_v48  ;;  %5010 = vmatprep.mubr.msk.f32.mxu0 %vm244_vm0, %v4200_v33  ;;  %v6801_v33 = vld [vmem:[#allocation10_spill] sm:$0xff] }
  0xb1   : > { %4787 = vmatmul.mubr.msk.f32.gmra.mrb[14].mxu1 %vm244_vm0, %v5751_v50  ;;  %5011 = vmatmul.mubr.msk.f32.gmra.mrb[30].mxu0 %vm244_vm0, %v4201_v61  ;;  %v6802_v61 = vld [vmem:[#allocation23_spill] sm:$0xff] }
  0xb2   : > { %4789 = vmatprep.mubr.msk.f32.mxu1 %vm244_vm0, %v5757_v52  ;;  %5015 = vmatprep.mubr.msk.f32.mxu0 %vm244_vm0, %v5511_v8  ;;  %v6784_v8 = vld [vmem:[#allocation27_spill] sm:$0xff] }
  0xb5   : > { %4790 = vmatmul.mubr.msk.f32.gmra.mrb[16].mxu1 %vm244_vm0, %v5771_v54  ;;  %5016 = vmatmul.mubr.msk.f32.vlgmr.msra.gmra.mrb[0].mxu0 %vm244_vm0, %v5524_v11  ;;  %v6785_v11 = vld [vmem:[#allocation2_spill] sm:$0xff] }
  0xb6   : > { %5064 = vmatpush3.msra.mxu0 %v5954_v37  ;;  %4792 = vmatprep.mubr.msk.f32.mxu1 %vm244_vm0, %v5775_v56  ;;  %v6799_v37 = vld [vmem:[#allocation9_spill] sm:$0xff] }
  0xb7   : > { %5018 = vmatprep.mubr.msk.f32.mxu0 %vm244_vm0, %v5530_v12  ;;  %v6786_v12 = vld [vmem:[#allocation15_spill] sm:$0xff] }
  0xb9   : > { %4793 = vmatmul.mubr.msk.f32.gmra.mrb[18].mxu1 %vm244_vm0, %v5786_v58  ;;  %5019 = vmatmul.mubr.msk.f32.gmra.mrb[2].mxu0 %vm244_vm0, %v5541_v13  ;;  %v6787_v13 = vld [vmem:[#allocation3_spill] sm:$0xff] }
  0xba   : > { %4795 = vmatprep.mubr.msk.f32.mxu1 %vm244_vm0, %v5792_v60  ;;  %5021 = vmatprep.mubr.msk.f32.mxu0 %vm244_vm0, %v5544_v14  ;;  %v6788_v14 = vld [vmem:[#allocation16_spill] sm:$0xff] }
  0xbd   : > { %4796 = vmatmul.mubr.msk.f32.gmra.mrb[20].mxu1 %vm244_vm0, %v5809_v63  ;;  %5022 = vmatmul.mubr.msk.f32.gmra.mrb[4].mxu0 %vm244_vm0, %v5555_v15  ;;  %v6789_v15 = vld [vmem:[#allocation4_spill] sm:$0xff] }
  0xbe   : > { %4798 = vmatprep.mubr.msk.f32.mxu1 %vm244_vm0, %v5817_v2  ;;  %5024 = vmatprep.mubr.msk.f32.mxu0 %vm244_vm0, %v5558_v16  ;;  %v6790_v16 = vld [vmem:[#allocation17_spill] sm:$0xff] }
  0xc1   : > { %4799 = vmatmul.mubr.msk.f32.gmra.mrb[22].mxu1 %vm244_vm0, %v5832_v4  ;;  %5025 = vmatmul.mubr.msk.f32.gmra.mrb[6].mxu0 %vm244_vm0, %v5569_v17  ;;  %v6791_v17 = vld [vmem:[#allocation5_spill] sm:$0xff] }
  0xc2   : > { %4801 = vmatprep.mubr.msk.f32.mxu1 %vm244_vm0, %v5838_v6  ;;  %5027 = vmatprep.mubr.msk.f32.mxu0 %vm244_vm0, %v5572_v18  ;;  %v6792_v18 = vld [vmem:[#allocation18_spill] sm:$0xff] }
  0xc5   : > { %4802 = vmatmul.mubr.msk.f32.gmra.mrb[24].mxu1 %vm244_vm0, %v5852_v9  ;;  %5028 = vmatmul.mubr.msk.f32.gmra.mrb[8].mxu0 %vm244_vm0, %v5583_v19  ;;  %v6793_v19 = vld [vmem:[#allocation6_spill] sm:$0xff] }
  0xc6   : > { %4804 = vmatprep.mubr.msk.f32.mxu1 %vm244_vm0, %v5858_v55  ;;  %5030 = vmatprep.mubr.msk.f32.mxu0 %vm244_vm0, %v5586_v20  ;;  %v6794_v20 = vld [vmem:[#allocation19_spill] sm:$0xff] }
  0xc9   : > { %4805 = vmatmul.mubr.msk.f32.gmra.mrb[26].mxu1 %vm244_vm0, %v5872_v53  ;;  %5031 = vmatmul.mubr.msk.f32.gmra.mrb[10].mxu0 %vm244_vm0, %v5597_v21  ;;  %v6795_v21 = vld [vmem:[#allocation7_spill] sm:$0xff] }
  0xca   : > { %4807 = vmatprep.mubr.msk.f32.mxu1 %vm244_vm0, %v5878_v49  ;;  %5033 = vmatprep.mubr.msk.f32.mxu0 %vm244_vm0, %v5600_v22  ;;  %v6797_v22 = vld [vmem:[#allocation8_spill] sm:$0xff] }
  0xcd   : > { %4808 = vmatmul.mubr.msk.f32.gmra.mrb[28].mxu1 %vm244_vm0, %v5892_v45  ;;  %5034 = vmatmul.mubr.msk.f32.gmra.mrb[12].mxu0 %vm244_vm0, %v5611_v23  ;;  %v6798_v23 = vld [vmem:[#allocation21_spill] sm:$0xff] }
  0xce   : > { %4810 = vmatprep.mubr.msk.f32.mxu1 %vm244_vm0, %v5898_v41  ;;  %5036 = vmatprep.mubr.msk.f32.mxu0 %vm244_vm0, %v5628_v26 }
  0xd1   : > { %4811 = vmatmul.mubr.msk.f32.gmra.mrb[30].mxu1 %vm244_vm0, %v6784_v8  ;;  %5037 = vmatmul.mubr.msk.f32.gmra.mrb[14].mxu0 %vm244_vm0, %v6785_v11  ;;  %v6811_v8 = vld [vmem:[#allocation30_spill] sm:$0xff] }
  0xd2   : > { %4815 = vmatprep.mubr.msk.f32.mxu1 %vm244_vm0, %v6786_v12  ;;  %5039 = vmatprep.mubr.msk.f32.mxu0 %vm244_vm0, %v6787_v13  ;;  %v6803_v12 = vld [vmem:[#allocation11_spill] sm:$0xff] }
  0xd5   : > { %4816 = vmatmul.mubr.msk.f32.vlgmr.msra.gmra.mrb[0].mxu1 %vm244_vm0, %v6788_v14  ;;  %5040 = vmatmul.mubr.msk.f32.gmra.mrb[16].mxu0 %vm244_vm0, %v6789_v15  ;;  %v6804_v14 = vld [vmem:[#allocation24_spill] sm:$0xff] }
  0xd6   : > { %5114 = vmatpush3.msra.mxu1 %v5486_v1  ;;  %4818 = vmatprep.mubr.msk.f32.mxu1 %vm244_vm0, %v6790_v16  ;;  %v6796_v1 = vld [vmem:[#allocation20_spill] sm:$0xff] }
  0xd7   : > { %5042 = vmatprep.mubr.msk.f32.mxu0 %vm244_vm0, %v6791_v17  ;;  %v6805_v16 = vld [vmem:[#allocation12_spill] sm:$0xff] }
  0xd9   : > { %4819 = vmatmul.mubr.msk.f32.gmra.mrb[2].mxu1 %vm244_vm0, %v6792_v18  ;;  %5043 = vmatmul.mubr.msk.f32.gmra.mrb[18].mxu0 %vm244_vm0, %v6793_v19  ;;  %v6806_v18 = vld [vmem:[#allocation25_spill] sm:$0xff] }
  0xda   : > { %4821 = vmatprep.mubr.msk.f32.mxu1 %vm244_vm0, %v6794_v20  ;;  %5045 = vmatprep.mubr.msk.f32.mxu0 %vm244_vm0, %v6795_v21  ;;  %v6807_v20 = vld [vmem:[#allocation13_spill] sm:$0xff] }
  0xdd   : > { %4822 = vmatmul.mubr.msk.f32.gmra.mrb[4].mxu1 %vm244_vm0, %v6796_v1  ;;  %5046 = vmatmul.mubr.msk.f32.gmra.mrb[20].mxu0 %vm244_vm0, %v6797_v22  ;;  %v6240_v1 = vld [vmem:[%s5502_s25 + $0x181] sm:$0xff] }
  0xde   : > { %4824 = vmatprep.mubr.msk.f32.mxu1 %vm244_vm0, %v6798_v23  ;;  %5048 = vmatprep.mubr.msk.f32.mxu0 %vm244_vm0, %v6799_v37  ;;  %v6808_v23 = vld [vmem:[#allocation26_spill] sm:$0xff] }
  0xe1   : > { %4825 = vmatmul.mubr.msk.f32.gmra.mrb[6].mxu1 %vm244_vm0, %v6800_v3  ;;  %5049 = vmatmul.mubr.msk.f32.gmra.mrb[22].mxu0 %vm244_vm0, %v6801_v33  ;;  %v6809_v3 = vld [vmem:[#allocation14_spill] sm:$0xff] }
  0xe2   : > { %4827 = vmatprep.mubr.msk.f32.mxu1 %vm244_vm0, %v6802_v61  ;;  %5051 = vmatprep.mubr.msk.f32.mxu0 %vm244_vm0, %v6803_v12  ;;  %v6810_v61 = vld [vmem:[#allocation28_spill] sm:$0xff] }
  0xe5   : > { %4828 = vmatmul.mubr.msk.f32.gmra.mrb[8].mxu1 %vm244_vm0, %v6804_v14  ;;  %5052 = vmatmul.mubr.msk.f32.gmra.mrb[24].mxu0 %vm244_vm0, %v6805_v16  ;;  %v6251_v14 = vld [vmem:[%s5502_s25 + $0x189] sm:$0xff] }
  0xe6   : > { %4830 = vmatprep.mubr.msk.f32.mxu1 %vm244_vm0, %v6806_v18  ;;  %5054 = vmatprep.mubr.msk.f32.mxu0 %vm244_vm0, %v6807_v20  ;;  %v4264_v18 = vld [vmem:[%s5502_s25 + $0x199] sm:$0xff] }
  0xe9   : > { %4831 = vmatmul.mubr.msk.f32.gmra.mrb[10].mxu1 %vm244_vm0, %v6808_v23  ;;  %5055 = vmatmul.mubr.msk.f32.gmra.mrb[26].mxu0 %vm244_vm0, %v6809_v3  ;;  %v4265_v23 = vld [vmem:[%s5502_s25 + $0x1a1] sm:$0xff]  ;;  %v6812_v3 = vld [vmem:[#allocation32_spill] sm:$0xff] }
  0xea   : > { %4833 = vmatprep.mubr.msk.f32.mxu1 %vm244_vm0, %v6810_v61  ;;  %5057 = vmatprep.mubr.msk.f32.mxu0 %vm244_vm0, %v6240_v1 }
  0xed   : > { %4834 = vmatmul.mubr.msk.f32.gmra.mrb[12].mxu1 %vm244_vm0, %v6811_v8  ;;  %5058 = vmatmul.mubr.msk.f32.gmra.mrb[28].mxu0 %vm244_vm0, %v6251_v14 }
  0xee   : > { %4836 = vmatprep.mubr.msk.f32.mxu1 %vm244_vm0, %v5935_v59  ;;  %5060 = vmatprep.mubr.msk.f32.mxu0 %vm244_vm0, %v4264_v18 }
  0xf1   : > { %4837 = vmatmul.mubr.msk.f32.gmra.mrb[14].mxu1 %vm244_vm0, %v6812_v3  ;;  %5061 = vmatmul.mubr.msk.f32.gmra.mrb[30].mxu0 %vm244_vm0, %v4265_v23 }
  0xf2   : > { %4839 = vmatprep.mubr.msk.f32.mxu1 %vm244_vm0, %v5949_v29  ;;  %5065 = vmatprep.mubr.msk.f32.mxu0 %vm244_vm0, %v5631_v27  ;;  %v6814_v27 = vld [vmem:[#allocation29_spill] sm:$0xff] }
  0xf3   : > { %v4328_v29 = vld [vmem:[%s5502_s25 + $0x19a] sm:$0xff] }
  0xf5   : > { %4840 = vmatmul.mubr.msk.f32.gmra.mrb[16].mxu1 %vm244_vm0, %v5964_v31  ;;  %5066 = vmatmul.mubr.msk.f32.vlgmr.msra.gmra.mrb[0].mxu0 %vm244_vm0, %v5648_v30  ;;  %v6815_v30 = vld [vmem:[#allocation14_spill] sm:$0xff]  ;;  %v6816_v31 = vld [vmem:[#allocation31_spill] sm:$0xff] }
  0xf6   : > { %4842 = vmatprep.mubr.msk.f32.mxu1 %vm244_vm0, %v5969_v0  ;;  %5068 = vmatprep.mubr.msk.f32.mxu0 %vm244_vm0, %v5656_v32  ;;  %v4329_v32 = vld [vmem:[%s5502_s25 + $0x1a2] sm:$0xff] }
  0xf9   : > { %4843 = vmatmul.mubr.msk.f32.gmra.mrb[18].mxu1 %vm244_vm0, %v5981_v28  ;;  %5069 = vmatmul.mubr.msk.f32.gmra.mrb[2].mxu0 %vm244_vm0, %v5671_v34 }
  0xfa   : > { %4845 = vmatprep.mubr.msk.f32.mxu1 %vm244_vm0, %v5984_v5  ;;  %5071 = vmatprep.mubr.msk.f32.mxu0 %vm244_vm0, %v5677_v36 }
  0xfd   : > { %4846 = vmatmul.mubr.msk.f32.gmra.mrb[20].mxu1 %vm244_vm0, %v5995_v7  ;;  %5072 = vmatmul.mubr.msk.f32.gmra.mrb[4].mxu0 %vm244_vm0, %v5691_v38 }
  0xfe   : > { %4848 = vmatprep.mubr.msk.f32.mxu1 %vm244_vm0, %v5998_v10  ;;  %5074 = vmatprep.mubr.msk.f32.mxu0 %vm244_vm0, %v5697_v40 }
 0x101   : > { %4849 = vmatmul.mubr.msk.f32.gmra.mrb[22].mxu1 %vm244_vm0, %v6009_v57  ;;  %5075 = vmatmul.mubr.msk.f32.gmra.mrb[6].mxu0 %vm244_vm0, %v5711_v42 }
 0x102   : > { %4851 = vmatprep.mubr.msk.f32.mxu1 %vm244_vm0, %v6012_v51  ;;  %5077 = vmatprep.mubr.msk.f32.mxu0 %vm244_vm0, %v5717_v44 }
 0x105   : > { %4852 = vmatmul.mubr.msk.f32.gmra.mrb[24].mxu1 %vm244_vm0, %v6023_v47  ;;  %5078 = vmatmul.mubr.msk.f32.gmra.mrb[8].mxu0 %vm244_vm0, %v5731_v46 }
 0x106   : > { %4854 = vmatprep.mubr.msk.f32.mxu1 %vm244_vm0, %v6026_v43  ;;  %5080 = vmatprep.mubr.msk.f32.mxu0 %vm244_vm0, %v5737_v48 }
 0x109   : > { %4855 = vmatmul.mubr.msk.f32.gmra.mrb[26].mxu1 %vm244_vm0, %v6037_v39  ;;  %5081 = vmatmul.mubr.msk.f32.gmra.mrb[10].mxu0 %vm244_vm0, %v5751_v50 }
 0x10a   : > { %4857 = vmatprep.mubr.msk.f32.mxu1 %vm244_vm0, %v6040_v35  ;;  %5083 = vmatprep.mubr.msk.f32.mxu0 %vm244_vm0, %v5757_v52  ;;  %v6408_v52 = vld [vmem:[%s6706_s2] ss:$0 sm:$0xff] }
 0x10d   : > { %4858 = vmatmul.mubr.msk.f32.gmra.mrb[28].mxu1 %vm244_vm0, %v6051_v62  ;;  %5084 = vmatmul.mubr.msk.f32.gmra.mrb[12].mxu0 %vm244_vm0, %v5771_v54 }
 0x10e   : > { %4860 = vmatprep.mubr.msk.f32.mxu1 %vm244_vm0, %v6104_v24  ;;  %5086 = vmatprep.mubr.msk.f32.mxu0 %vm244_vm0, %v5775_v56  ;;  %v3623_v24 = vlaneseq }
 0x111   : > { %4861 = vmatmul.mubr.msk.f32.gmra.mrb[30].mxu1 %vm244_vm0, %v6115_v25  ;;  %5087 = vmatmul.mubr.msk.f32.gmra.mrb[14].mxu0 %vm244_vm0, %v5786_v58 }
 0x112   : > { %4889 = vmatprep.mubr.msk.f32.mxu1 %vm244_vm0, %v5628_v26  ;;  %5089 = vmatprep.mubr.msk.f32.mxu0 %vm244_vm0, %v5792_v60  ;;  %v6813_v26 = vld [vmem:[#allocation27_spill] sm:$0xff] }
 0x115   : > { %4890 = vmatmul.mubr.msk.f32.vlgmr.msra.gmra.mrb[16].mxu1 %vm244_vm0, %v6785_v11  ;;  %5090 = vmatmul.mubr.msk.f32.gmra.mrb[16].mxu0 %vm244_vm0, %v5809_v63 }
 0x116   : > { %4892 = vmatprep.mubr.msk.f32.mxu1 %vm244_vm0, %v6787_v13  ;;  %5092 = vmatprep.mubr.msk.f32.mxu0 %vm244_vm0, %v5817_v2 }
 0x119   : > { %4893 = vmatmul.mubr.msk.f32.gmra.mrb[18].mxu1 %vm244_vm0, %v6789_v15  ;;  %5093 = vmatmul.mubr.msk.f32.gmra.mrb[18].mxu0 %vm244_vm0, %v5832_v4 }
 0x11a   : > { %4895 = vmatprep.mubr.msk.f32.mxu1 %vm244_vm0, %v6791_v17  ;;  %5095 = vmatprep.mubr.msk.f32.mxu0 %vm244_vm0, %v5838_v6 }
 0x11d   : > { %4896 = vmatmul.mubr.msk.f32.gmra.mrb[20].mxu1 %vm244_vm0, %v6793_v19  ;;  %5096 = vmatmul.mubr.msk.f32.gmra.mrb[20].mxu0 %vm244_vm0, %v5852_v9 }
 0x11e   : > { %4898 = vmatprep.mubr.msk.f32.mxu1 %vm244_vm0, %v6795_v21  ;;  %5098 = vmatprep.mubr.msk.f32.mxu0 %vm244_vm0, %v5858_v55 }
 0x121   : > { %4899 = vmatmul.mubr.msk.f32.gmra.mrb[22].mxu1 %vm244_vm0, %v6797_v22  ;;  %5099 = vmatmul.mubr.msk.f32.gmra.mrb[22].mxu0 %vm244_vm0, %v5872_v53  ;;  %v6431_v22 = vand.u32 127, %v3623_v24 }
 0x122   : > { %4901 = vmatprep.mubr.msk.f32.mxu1 %vm244_vm0, %v6799_v37  ;;  %5101 = vmatprep.mubr.msk.f32.mxu0 %vm244_vm0, %v5878_v49 }
 0x123   : > { %vm3625_vm1 = vcmp.lt.s32.totalorder %v6431_v22, 18 }
 0x125   : > { %4902 = vmatmul.mubr.msk.f32.gmra.mrb[24].mxu1 %vm244_vm0, %v6801_v33  ;;  %5102 = vmatmul.mubr.msk.f32.gmra.mrb[24].mxu0 %vm244_vm0, %v5892_v45 }
 0x126   : > { %4904 = vmatprep.mubr.msk.f32.mxu1 %vm244_vm0, %v6803_v12  ;;  %5104 = vmatprep.mubr.msk.f32.mxu0 %vm244_vm0, %v5898_v41 }
 0x129   : > { %4905 = vmatmul.mubr.msk.f32.gmra.mrb[26].mxu1 %vm244_vm0, %v6805_v16  ;;  %5105 = vmatmul.mubr.msk.f32.gmra.mrb[26].mxu0 %vm244_vm0, %v6813_v26 }
 0x12a   : > { %4907 = vmatprep.mubr.msk.f32.mxu1 %vm244_vm0, %v6807_v20  ;;  %5107 = vmatprep.mubr.msk.f32.mxu0 %vm244_vm0, %v6814_v27 }
 0x12d   : > { %4908 = vmatmul.mubr.msk.f32.gmra.mrb[28].mxu1 %vm244_vm0, %v6815_v30  ;;  %5108 = vmatmul.mubr.msk.f32.gmra.mrb[28].mxu0 %vm244_vm0, %v6816_v31 }
 0x12e   : > { %4910 = vmatprep.mubr.msk.f32.mxu1 %vm244_vm0, %v6240_v1  ;;  %5110 = vmatprep.mubr.msk.f32.mxu0 %vm244_vm0, %v4328_v29 }
 0x131   : > { %4911 = vmatmul.mubr.msk.f32.gmra.mrb[30].mxu1 %vm244_vm0, %v6251_v14  ;;  %5111 = vmatmul.mubr.msk.f32.gmra.mrb[30].mxu0 %vm244_vm0, %v4329_v32 }
 0x1a8   : > { %v4817_v34 = vpop.f32.mrb[0].mxu1 }
 0x1a9   : > { %v1467_v35 = vpop.f32.mrb[1].mxu1 }
 0x1ac   : > { %v4820_v36 = vpop.f32.mrb[2].mxu1 }
 0x1ad   : > { %v1477_v38 = vpop.f32.mrb[3].mxu1 }
 0x1b0   : > { %v4823_v39 = vpop.f32.mrb[4].mxu1 }
 0x1b1   : > { %v1487_v40 = vpop.f32.mrb[5].mxu1 }
 0x1b4   : > { %v4826_v41 = vpop.f32.mrb[6].mxu1 }
 0x1b5   : > { %v1497_v42 = vpop.f32.mrb[7].mxu1 }
 0x1b8   : > { %v4829_v43 = vpop.f32.mrb[8].mxu1 }
 0x1b9   : > { %v1507_v44 = vpop.f32.mrb[9].mxu1 }
 0x1bc   : > { %v6393_v45 = vpop.f32.mrb[10].mxu1 }
 0x1bd   : > { %v6395_v46 = vpop.f32.mrb[11].mxu1 }
 0x1c0   : > { %v6397_v47 = vpop.f32.mrb[12].mxu1 }
 0x1c1   : > { %v6399_v48 = vpop.f32.mrb[13].mxu1 }
 0x1c4   : > { %v6401_v49 = vpop.f32.mrb[14].mxu1 }
 0x1c5   : > { %v6403_v50 = vpop.f32.mrb[15].mxu1 }
 0x1c8   : > { %v5067_v51 = vpop.f32.mrb[0].mxu0 }
 0x1c9   : > { %v5115_v53 = vadd.f32 %v5067_v51, %v4817_v34  ;;  %v3393_v54 = vpop.f32.mrb[1].mxu0 }
 0x1ca   : > { %v5116_v56 = vadd.f32 %v3393_v54, %v1467_v35 }
 0x1cb   : > { %v3592_v58 = vadd.f32 %v5115_v53, %v6408_v52 }
 0x1cc   : > { %v6412_v59 = vadd.f32 %v5116_v56, %v6408_v52  ;;  %v5070_v60 = vpop.f32.mrb[2].mxu0 }
 0x1cd   : > { %v3627_v62 = vmul.f32 0.5, %v3592_v58  ;;  %v5117_v63 = vadd.f32 %v5070_v60, %v4820_v36  ;;  %v3403_v0 = vpop.f32.mrb[3].mxu0 }
 0x1ce   : > { %v3626_v2 = vmul.f32 0.5, %v6412_v59  ;;  %v5118_v4 = vadd.f32 %v3403_v0, %v1477_v38 }
 0x1cf   : > { %5380 = vtanh.f32 %v3627_v62  ;;  %v6416_v5 = vadd.f32 %v5117_v63, %v6408_v52 }
 0x1d0   : > { %5382 = vtanh.f32 %v3626_v2  ;;  %v6419_v6 = vadd.f32 %v5118_v4, %v6408_v52  ;;  %v5073_v7 = vpop.f32.mrb[4].mxu0 }
 0x1d1   : > { %v3629_v9 = vmul.f32 0.5, %v6416_v5  ;;  %v5119_v10 = vadd.f32 %v5073_v7, %v4823_v39  ;;  %v3413_v55 = vpop.f32.mrb[5].mxu0 }
 0x1d2   : > { %v3628_v57 = vmul.f32 0.5, %v6419_v6  ;;  %v5120_v28 = vadd.f32 %v3413_v55, %v1487_v40 }
 0x1d3   : > { %5384 = vtanh.f32 %v3629_v9  ;;  %v6424_v25 = vadd.f32 %v5119_v10, %v6408_v52 }
 0x1d4   : > { %5386 = vtanh.f32 %v3628_v57  ;;  %v6427_v8 = vadd.f32 %v5120_v28, %v6408_v52  ;;  %v5076_v11 = vpop.f32.mrb[6].mxu0 }
 0x1d5   : > { %v3631_v13 = vmul.f32 0.5, %v6424_v25  ;;  %v5121_v15 = vadd.f32 %v5076_v11, %v4826_v41  ;;  %v3423_v17 = vpop.f32.mrb[7].mxu0 }
 0x1d6   : > { %v3630_v19 = vmul.f32 0.5, %v6427_v8  ;;  %v5122_v21 = vadd.f32 %v3423_v17, %v1497_v42 }
 0x1d7   : > { %5388 = vtanh.f32 %v3631_v13  ;;  %v6434_v37 = vadd.f32 %v5121_v15, %v6408_v52 }
 0x1d8   : > { %5390 = vtanh.f32 %v3630_v19  ;;  %v6437_v33 = vadd.f32 %v5122_v21, %v6408_v52  ;;  %v5079_v12 = vpop.f32.mrb[8].mxu0 }
 0x1d9   : > { %v5381_v16 = vpop.eup %5380  ;;  %v3633_v20 = vmul.f32 0.5, %v6434_v37  ;;  %v5123_v1 = vadd.f32 %v5079_v12, %v4829_v43  ;;  %v3433_v3 = vpop.f32.mrb[9].mxu0 }
 0x1da   : > { %v5383_v61 = vpop.eup %5382  ;;  %v3691_v14 = vadd.f32 1.0, %v5381_v16  ;;  %v3632_v18 = vmul.f32 0.5, %v6437_v33  ;;  %v5124_v23 = vadd.f32 %v3433_v3, %v1507_v44 }
 0x1db   : > { %v3690_v26 = vadd.f32 1.0, %v5383_v61  ;;  %5392 = vtanh.f32 %v3633_v20  ;;  %v6444_v27 = vadd.f32 %v5123_v1, %v6408_v52 }
 0x1dc   : > { %v3723_v29 = vmul.f32 0.5, %v3691_v14  ;;  %5394 = vtanh.f32 %v3632_v18  ;;  %v6452_v30 = vadd.f32 %v5124_v23, %v6408_v52  ;;  %v5082_v31 = vpop.f32.mrb[10].mxu0 }
 0x1dd   : > { %v5385_v32 = vpop.eup %5384  ;;  %v3722_v34 = vmul.f32 0.5, %v3690_v26  ;;  %v3635_v35 = vmul.f32 0.5, %v6444_v27  ;;  %v5125_v36 = vadd.f32 %v5082_v31, %v6393_v45  ;;  %v3443_v38 = vpop.f32.mrb[11].mxu0 }
 0x1de   : > { %v5387_v39 = vpop.eup %5386  ;;  %v3755_v40 = vsel %vm3625_vm1, %v3592_v58, %v3723_v29  ;;  %v3693_v41 = vadd.f32 1.0, %v5385_v32  ;;  %v3634_v42 = vmul.f32 0.5, %v6452_v30  ;;  %v5126_v43 = vadd.f32 %v3443_v38, %v6395_v46 }
 0x1df   : > { %3788 = vst.msk [vmem:[%s6449_s13 + $0x8] sm:$0xff] %vm3786_vm2, %v3755_v40  ;;  %v3754_v44 = vsel %vm3625_vm1, %v6412_v59, %v3722_v34  ;;  %v3692_v51 = vadd.f32 1.0, %v5387_v39  ;;  %5396 = vtanh.f32 %v3635_v35  ;;  %v6466_v45 = vadd.f32 %v5125_v36, %v6408_v52 }
 0x1e0   : > { %3787 = vst.msk [vmem:[%s6449_s13] sm:$0xff] %vm3786_vm2, %v3754_v44  ;;  %v3725_v53 = vmul.f32 0.5, %v3693_v41  ;;  %5398 = vtanh.f32 %v3634_v42  ;;  %v6471_v54 = vadd.f32 %v5126_v43, %v6408_v52  ;;  %v5085_v46 = vpop.f32.mrb[12].mxu0 }
 0x1e1   : > { %v5389_v56 = vpop.eup %5388  ;;  %v3724_v58 = vmul.f32 0.5, %v3692_v51  ;;  %v3637_v60 = vmul.f32 0.5, %v6466_v45  ;;  %v5127_v59 = vadd.f32 %v5085_v46, %v6397_v47  ;;  %v3453_v62 = vpop.f32.mrb[13].mxu0 }
 0x1e2   : > { %v5391_v63 = vpop.eup %5390  ;;  %v3757_v0 = vsel %vm3625_vm1, %v6416_v5, %v3725_v53  ;;  %v3695_v2 = vadd.f32 1.0, %v5389_v56  ;;  %v3636_v4 = vmul.f32 0.5, %v6471_v54  ;;  %v5128_v7 = vadd.f32 %v3453_v62, %v6399_v48 }
 0x1e3   : > { %3790 = vst.msk [vmem:[%s6449_s13 + $0x18] sm:$0xff] %vm3786_vm2, %v3757_v0  ;;  %v3756_v9 = vsel %vm3625_vm1, %v6419_v6, %v3724_v58  ;;  %v3694_v10 = vadd.f32 1.0, %v5391_v63  ;;  %5400 = vtanh.f32 %v3637_v60  ;;  %v6486_v47 = vadd.f32 %v5127_v59, %v6408_v52 }
 0x1e4   : > { %3789 = vst.msk [vmem:[%s6449_s13 + $0x10] sm:$0xff] %vm3786_vm2, %v3756_v9  ;;  %v3727_v5 = vmul.f32 0.5, %v3695_v2  ;;  %5402 = vtanh.f32 %v3636_v4  ;;  %v6491_v55 = vadd.f32 %v5128_v7, %v6408_v52  ;;  %v5088_v48 = vpop.f32.mrb[14].mxu0 }
 0x1e5   : > { %v5393_v57 = vpop.eup %5392  ;;  %v3726_v28 = vmul.f32 0.5, %v3694_v10  ;;  %v3639_v24 = vmul.f32 0.5, %v6486_v47  ;;  %v5129_v6 = vadd.f32 %v5088_v48, %v6401_v49  ;;  %v3463_v11 = vpop.f32.mrb[15].mxu0 }
 0x1e6   : > { %v5395_v13 = vpop.eup %5394  ;;  %v3759_v15 = vsel %vm3625_vm1, %v6424_v25, %v3727_v5  ;;  %v3697_v17 = vadd.f32 1.0, %v5393_v57  ;;  %v3638_v19 = vmul.f32 0.5, %v6491_v55  ;;  %v5130_v21 = vadd.f32 %v3463_v11, %v6403_v50 }
 0x1e7   : > { %3792 = vst.msk [vmem:[%s6449_s13 + $0x28] sm:$0xff] %vm3786_vm2, %v3759_v15  ;;  %v3758_v12 = vsel %vm3625_vm1, %v6427_v8, %v3726_v28  ;;  %v3696_v16 = vadd.f32 1.0, %v5395_v13  ;;  %5404 = vtanh.f32 %v3639_v24  ;;  %v6506_v49 = vadd.f32 %v5129_v6, %v6408_v52 }
 0x1e8   : > { %3791 = vst.msk [vmem:[%s6449_s13 + $0x20] sm:$0xff] %vm3786_vm2, %v3758_v12  ;;  %v3729_v20 = vmul.f32 0.5, %v3697_v17  ;;  %5406 = vtanh.f32 %v3638_v19  ;;  %v6511_v25 = vadd.f32 %v5130_v21, %v6408_v52  ;;  %v4891_v50 = vpop.f32.mrb[16].mxu1  ;;  %v5091_v1 = vpop.f32.mrb[16].mxu0 }
 0x1e9   : > { %v5397_v3 = vpop.eup %5396  ;;  %v3728_v61 = vmul.f32 0.5, %v3696_v16  ;;  %v3641_v8 = vmul.f32 0.5, %v6506_v49  ;;  %v5131_v14 = vadd.f32 %v5091_v1, %v4891_v50  ;;  %v1932_v18 = vpop.f32.mrb[17].mxu1 }
 0x1ea   : > { %v3473_v23 = vpop.f32.mrb[17].mxu0  ;;  %v5399_v26 = vpop.eup %5398  ;;  %v3761_v29 = vsel %vm3625_vm1, %v6434_v37, %v3729_v20  ;;  %v3699_v31 = vadd.f32 1.0, %v5397_v3  ;;  %v3640_v32 = vmul.f32 0.5, %v6511_v25 }
 0x1eb   : > { %v5132_v34 = vadd.f32 %v3473_v23, %v1932_v18  ;;  %3794 = vst.msk [vmem:[%s6449_s13 + $0x38] sm:$0xff] %vm3786_vm2, %v3761_v29  ;;  %v3760_v35 = vsel %vm3625_vm1, %v6437_v33, %v3728_v61  ;;  %v3698_v36 = vadd.f32 1.0, %v5399_v26  ;;  %5408 = vtanh.f32 %v3641_v8 }
 0x1ec   : > { %v6524_v38 = vadd.f32 %v5131_v14, %v6408_v52  ;;  %3793 = vst.msk [vmem:[%s6449_s13 + $0x30] sm:$0xff] %vm3786_vm2, %v3760_v35  ;;  %v3731_v39 = vmul.f32 0.5, %v3699_v31  ;;  %5410 = vtanh.f32 %v3640_v32  ;;  %v4894_v40 = vpop.f32.mrb[18].mxu1  ;;  %v5094_v41 = vpop.f32.mrb[18].mxu0 }
 0x1ed   : > { %v6529_v37 = vadd.f32 %v5132_v34, %v6408_v52  ;;  %v5401_v42 = vpop.eup %5400  ;;  %v3730_v43 = vmul.f32 0.5, %v3698_v36  ;;  %v5133_v44 = vadd.f32 %v5094_v41, %v4894_v40  ;;  %v1942_v51 = vpop.f32.mrb[19].mxu1 }
 0x1ee   : > { %v3643_v33 = vmul.f32 0.5, %v6524_v38  ;;  %v3483_v53 = vpop.f32.mrb[19].mxu0  ;;  %v5403_v46 = vpop.eup %5402  ;;  %v3763_v56 = vsel %vm3625_vm1, %v6444_v27, %v3731_v39  ;;  %v3701_v58 = vadd.f32 1.0, %v5401_v42 }
 0x1ef   : > { %v3642_v60 = vmul.f32 0.5, %v6529_v37  ;;  %v5134_v59 = vadd.f32 %v3483_v53, %v1942_v51  ;;  %3796 = vst.msk [vmem:[%s6449_s13 + $0x48] sm:$0xff] %vm3786_vm2, %v3763_v56  ;;  %v3762_v62 = vsel %vm3625_vm1, %v6452_v30, %v3730_v43  ;;  %v3700_v63 = vadd.f32 1.0, %v5403_v46 }
 0x1f0   : > { %5412 = vtanh.f32 %v3643_v33  ;;  %v6542_v0 = vadd.f32 %v5133_v44, %v6408_v52  ;;  %3795 = vst.msk [vmem:[%s6449_s13 + $0x40] sm:$0xff] %vm3786_vm2, %v3762_v62  ;;  %v3733_v2 = vmul.f32 0.5, %v3701_v58  ;;  %v4897_v4 = vpop.f32.mrb[20].mxu1  ;;  %v5097_v7 = vpop.f32.mrb[20].mxu0 }
 0x1f1   : > { %5414 = vtanh.f32 %v3642_v60  ;;  %v6547_v27 = vadd.f32 %v5134_v59, %v6408_v52  ;;  %v5405_v9 = vpop.eup %5404  ;;  %v3732_v10 = vmul.f32 0.5, %v3700_v63  ;;  %v5135_v5 = vadd.f32 %v5097_v7, %v4897_v4  ;;  %v1952_v48 = vpop.f32.mrb[21].mxu1 }
 0x1f2   : > { %v3645_v30 = vmul.f32 0.5, %v6542_v0  ;;  %v3493_v57 = vpop.f32.mrb[21].mxu0  ;;  %v5407_v28 = vpop.eup %5406  ;;  %v3765_v24 = vsel %vm3625_vm1, %v6466_v45, %v3733_v2  ;;  %v3703_v6 = vadd.f32 1.0, %v5405_v9 }
 0x1f3   : > { %v3644_v11 = vmul.f32 0.5, %v6547_v27  ;;  %v5136_v13 = vadd.f32 %v3493_v57, %v1952_v48  ;;  %3798 = vst.msk [vmem:[%s6449_s13 + $0x58] sm:$0xff] %vm3786_vm2, %v3765_v24  ;;  %v3764_v15 = vsel %vm3625_vm1, %v6471_v54, %v3732_v10  ;;  %v3702_v17 = vadd.f32 1.0, %v5407_v28 }
 0x1f4   : > { %5416 = vtanh.f32 %v3645_v30  ;;  %v6560_v19 = vadd.f32 %v5135_v5, %v6408_v52  ;;  %3797 = vst.msk [vmem:[%s6449_s13 + $0x50] sm:$0xff] %vm3786_vm2, %v3764_v15  ;;  %v3735_v21 = vmul.f32 0.5, %v3703_v6  ;;  %v4900_v12 = vpop.f32.mrb[22].mxu1  ;;  %v5100_v16 = vpop.f32.mrb[22].mxu0 }
 0x1f5   : > { %5418 = vtanh.f32 %v3644_v11  ;;  %v6565_v45 = vadd.f32 %v5136_v13, %v6408_v52  ;;  %v5409_v20 = vpop.eup %5408  ;;  %v3734_v50 = vmul.f32 0.5, %v3702_v17  ;;  %v5137_v1 = vadd.f32 %v5100_v16, %v4900_v12  ;;  %v1962_v3 = vpop.f32.mrb[23].mxu1 }
 0x1f6   : > { %v3647_v54 = vmul.f32 0.5, %v6560_v19  ;;  %v3503_v61 = vpop.f32.mrb[23].mxu0  ;;  %v5411_v8 = vpop.eup %5410  ;;  %v3767_v14 = vsel %vm3625_vm1, %v6486_v47, %v3735_v21  ;;  %v3705_v18 = vadd.f32 1.0, %v5409_v20 }
 0x1f7   : > { %v3646_v23 = vmul.f32 0.5, %v6565_v45  ;;  %v5138_v26 = vadd.f32 %v3503_v61, %v1962_v3  ;;  %3800 = vst.msk [vmem:[%s6449_s13 + $0x68] sm:$0xff] %vm3786_vm2, %v3767_v14  ;;  %v3766_v29 = vsel %vm3625_vm1, %v6491_v55, %v3734_v50  ;;  %v3704_v31 = vadd.f32 1.0, %v5411_v8 }
 0x1f8   : > { %5420 = vtanh.f32 %v3647_v54  ;;  %v6578_v32 = vadd.f32 %v5137_v1, %v6408_v52  ;;  %3799 = vst.msk [vmem:[%s6449_s13 + $0x60] sm:$0xff] %vm3786_vm2, %v3766_v29  ;;  %v3737_v34 = vmul.f32 0.5, %v3705_v18  ;;  %v4903_v35 = vpop.f32.mrb[24].mxu1  ;;  %v5103_v36 = vpop.f32.mrb[24].mxu0 }
 0x1f9   : > { %5422 = vtanh.f32 %v3646_v23  ;;  %v6583_v47 = vadd.f32 %v5138_v26, %v6408_v52  ;;  %v3736_v40 = vmul.f32 0.5, %v3704_v31  ;;  %v5139_v41 = vadd.f32 %v5103_v36, %v4903_v35  ;;  %v1972_v42 = vpop.f32.mrb[25].mxu1  ;;  %v3513_v43 = vpop.f32.mrb[25].mxu0 }
 0x1fa   : > { %v5413_v39 = vpop.eup %5412  ;;  %v3649_v55 = vmul.f32 0.5, %v6578_v32  ;;  %v3769_v44 = vsel %vm3625_vm1, %v6506_v49, %v3737_v34  ;;  %v5140_v46 = vadd.f32 %v3513_v43, %v1972_v42 }
 0x1fb   : > { %v5415_v33 = vpop.eup %5414  ;;  %v3707_v51 = vadd.f32 1.0, %v5413_v39  ;;  %v3648_v53 = vmul.f32 0.5, %v6583_v47  ;;  %3802 = vst.msk [vmem:[%s6449_s13 + $0x78] sm:$0xff] %vm3786_vm2, %v3769_v44  ;;  %v3768_v56 = vsel %vm3625_vm1, %v6511_v25, %v3736_v40  ;;  %v6596_v60 = vadd.f32 %v5139_v41, %v6408_v52 }
 0x1fc   : > { %v3706_v58 = vadd.f32 1.0, %v5415_v33  ;;  %5424 = vtanh.f32 %v3649_v55  ;;  %3801 = vst.msk [vmem:[%s6449_s13 + $0x70] sm:$0xff] %vm3786_vm2, %v3768_v56  ;;  %v6601_v49 = vadd.f32 %v5140_v46, %v6408_v52  ;;  %v4906_v62 = vpop.f32.mrb[26].mxu1  ;;  %v5106_v63 = vpop.f32.mrb[26].mxu0 }
 0x1fd   : > { %v3739_v59 = vmul.f32 0.5, %v3707_v51  ;;  %5426 = vtanh.f32 %v3648_v53  ;;  %v3651_v25 = vmul.f32 0.5, %v6596_v60  ;;  %v5141_v7 = vadd.f32 %v5106_v63, %v4906_v62  ;;  %v1982_v9 = vpop.f32.mrb[27].mxu1  ;;  %v3523_v10 = vpop.f32.mrb[27].mxu0 }
 0x1fe   : > { %v5417_v2 = vpop.eup %5416  ;;  %v3738_v4 = vmul.f32 0.5, %v3706_v58  ;;  %v3650_v57 = vmul.f32 0.5, %v6601_v49  ;;  %v5142_v28 = vadd.f32 %v3523_v10, %v1982_v9 }
 0x1ff   : > { %v5419_v30 = vpop.eup %5418  ;;  %v3771_v5 = vsel %vm3625_vm1, %v6524_v38, %v3739_v59  ;;  %v3709_v48 = vadd.f32 1.0, %v5417_v2  ;;  %5428 = vtanh.f32 %v3651_v25  ;;  %v6614_v11 = vadd.f32 %v5141_v7, %v6408_v52 }
 0x200   : > { %3804 = vst.msk [vmem:[%s6449_s13 + $0x88] sm:$0xff] %vm3786_vm2, %v3771_v5  ;;  %v3770_v24 = vsel %vm3625_vm1, %v6529_v37, %v3738_v4  ;;  %v3708_v6 = vadd.f32 1.0, %v5419_v30  ;;  %5430 = vtanh.f32 %v3650_v57  ;;  %v6619_v38 = vadd.f32 %v5142_v28, %v6408_v52  ;;  %v4909_v15 = vpop.f32.mrb[28].mxu1  ;;  %v5109_v17 = vpop.f32.mrb[28].mxu0 }
 0x201   : > { %3803 = vst.msk [vmem:[%s6449_s13 + $0x80] sm:$0xff] %vm3786_vm2, %v3770_v24  ;;  %v3741_v13 = vmul.f32 0.5, %v3709_v48  ;;  %v3653_v37 = vmul.f32 0.5, %v6614_v11  ;;  %v5143_v16 = vadd.f32 %v5109_v17, %v4909_v15  ;;  %v1992_v20 = vpop.f32.mrb[29].mxu1  ;;  %v3533_v50 = vpop.f32.mrb[29].mxu0 }
 0x202   : > { %v5421_v21 = vpop.eup %5420  ;;  %v3740_v12 = vmul.f32 0.5, %v3708_v6  ;;  %v3652_v61 = vmul.f32 0.5, %v6619_v38  ;;  %v5144_v8 = vadd.f32 %v3533_v50, %v1992_v20 }
 0x203   : > { %v5423_v54 = vpop.eup %5422  ;;  %v3773_v1 = vsel %vm3625_vm1, %v6542_v0, %v3741_v13  ;;  %v3711_v3 = vadd.f32 1.0, %v5421_v21  ;;  %5432 = vtanh.f32 %v3653_v37  ;;  %v6632_v23 = vadd.f32 %v5143_v16, %v6408_v52 }
 0x204   : > { %3806 = vst.msk [vmem:[%s6449_s13 + $0x98] sm:$0xff] %vm3786_vm2, %v3773_v1  ;;  %v3772_v14 = vsel %vm3625_vm1, %v6547_v27, %v3740_v12  ;;  %v3710_v18 = vadd.f32 1.0, %v5423_v54  ;;  %5434 = vtanh.f32 %v3652_v61  ;;  %v6637_v0 = vadd.f32 %v5144_v8, %v6408_v52  ;;  %v4912_v29 = vpop.f32.mrb[30].mxu1  ;;  %v5112_v31 = vpop.f32.mrb[30].mxu0 }
 0x205   : > { %3805 = vst.msk [vmem:[%s6449_s13 + $0x90] sm:$0xff] %vm3786_vm2, %v3772_v14  ;;  %v3743_v26 = vmul.f32 0.5, %v3711_v3  ;;  %v3655_v27 = vmul.f32 0.5, %v6632_v23  ;;  %v5145_v36 = vadd.f32 %v5112_v31, %v4912_v29  ;;  %v2002_v39 = vpop.f32.mrb[31].mxu1  ;;  %v3543_v40 = vpop.f32.mrb[31].mxu0 }
 0x206   : > { %v5425_v34 = vpop.eup %5424  ;;  %v3742_v35 = vmul.f32 0.5, %v3710_v18  ;;  %v3654_v43 = vmul.f32 0.5, %v6637_v0  ;;  %v5146_v33 = vadd.f32 %v3543_v40, %v2002_v39 }
 0x207   : > { %v5427_v55 = vpop.eup %5426  ;;  %v3775_v41 = vsel %vm3625_vm1, %v6560_v19, %v3743_v26  ;;  %v3713_v42 = vadd.f32 1.0, %v5425_v34  ;;  %5436 = vtanh.f32 %v3655_v27  ;;  %v3622_v53 = vadd.f32 %v5145_v36, %v6408_v52 }
 0x208   : > { %3808 = vst.msk [vmem:[%s6449_s13 + $0xa8] sm:$0xff] %vm3786_vm2, %v3775_v41  ;;  %v3774_v44 = vsel %vm3625_vm1, %v6565_v45, %v3742_v35  ;;  %v3712_v51 = vadd.f32 1.0, %v5427_v55  ;;  %5438 = vtanh.f32 %v3654_v43  ;;  %v3621_v19 = vadd.f32 %v5146_v33, %v6408_v52 }
 0x209   : > { %3807 = vst.msk [vmem:[%s6449_s13 + $0xa0] sm:$0xff] %vm3786_vm2, %v3774_v44  ;;  %v3745_v46 = vmul.f32 0.5, %v3713_v42  ;;  %v5429_v56 = vpop.eup %5428  ;;  %v3657_v59 = vmul.f32 0.5, %v3622_v53 }
 0x20a   : > { %v3744_v58 = vmul.f32 0.5, %v3712_v51  ;;  %v5431_v62 = vpop.eup %5430  ;;  %v3715_v63 = vadd.f32 1.0, %v5429_v56  ;;  %v3656_v2 = vmul.f32 0.5, %v3621_v19 }
 0x20b   : > { %v3777_v45 = vsel %vm3625_vm1, %v6578_v32, %v3745_v46  ;;  %v3714_v25 = vadd.f32 1.0, %v5431_v62  ;;  %5440 = vtanh.f32 %v3657_v59 }
 0x20c   : > { %3810 = vst.msk [vmem:[%s6449_s13 + $0xb8] sm:$0xff] %vm3786_vm2, %v3777_v45  ;;  %v3776_v4 = vsel %vm3625_vm1, %v6583_v47, %v3744_v58  ;;  %v3747_v52 = vmul.f32 0.5, %v3715_v63  ;;  %5442 = vtanh.f32 %v3656_v2 }
 0x20d   : > { %3809 = vst.msk [vmem:[%s6449_s13 + $0xb0] sm:$0xff] %vm3786_vm2, %v3776_v4  ;;  %v5433_v7 = vpop.eup %5432  ;;  %v3746_v9 = vmul.f32 0.5, %v3714_v25 }
 0x20e   : > { %v5435_v10 = vpop.eup %5434  ;;  %v3779_v32 = vsel %vm3625_vm1, %v6596_v60, %v3747_v52  ;;  %v3717_v30 = vadd.f32 1.0, %v5433_v7 }
 0x20f   : > { %3812 = vst.msk [vmem:[%s6449_s13 + $0xc8] sm:$0xff] %vm3786_vm2, %v3779_v32  ;;  %v3778_v47 = vsel %vm3625_vm1, %v6601_v49, %v3746_v9  ;;  %v3716_v5 = vadd.f32 1.0, %v5435_v10 }
 0x210   : > { %3811 = vst.msk [vmem:[%s6449_s13 + $0xc0] sm:$0xff] %vm3786_vm2, %v3778_v47  ;;  %v3749_v48 = vmul.f32 0.5, %v3717_v30 }
 0x211   : > { %v5437_v57 = vpop.eup %5436  ;;  %v3748_v28 = vmul.f32 0.5, %v3716_v5 }
 0x212   : > { %v5439_v24 = vpop.eup %5438  ;;  %v3781_v60 = vsel %vm3625_vm1, %v6614_v11, %v3749_v48  ;;  %v3719_v6 = vadd.f32 1.0, %v5437_v57 }
 0x213   : > { %3814 = vst.msk [vmem:[%s6449_s13 + $0xd8] sm:$0xff] %vm3786_vm2, %v3781_v60  ;;  %v3780_v49 = vsel %vm3625_vm1, %v6619_v38, %v3748_v28  ;;  %v3718_v13 = vadd.f32 1.0, %v5439_v24 }
 0x214   : > { %3813 = vst.msk [vmem:[%s6449_s13 + $0xd0] sm:$0xff] %vm3786_vm2, %v3780_v49  ;;  %v3751_v15 = vmul.f32 0.5, %v3719_v6 }
 0x215   : > { %v5441_v17 = vpop.eup %5440  ;;  %v3750_v21 = vmul.f32 0.5, %v3718_v13 }
 0x216   : > { %v5443_v12 = vpop.eup %5442  ;;  %v3783_v11 = vsel %vm3625_vm1, %v6632_v23, %v3751_v15  ;;  %v3721_v37 = vadd.f32 1.0, %v5441_v17 }
 0x217   : > { %3816 = vst.msk [vmem:[%s6449_s13 + $0xe8] sm:$0xff] %vm3786_vm2, %v3783_v11  ;;  %v3782_v38 = vsel %vm3625_vm1, %v6637_v0, %v3750_v21  ;;  %v3720_v16 = vadd.f32 1.0, %v5443_v12 }
 0x218   : > { %3815 = vst.msk [vmem:[%s6449_s13 + $0xe0] sm:$0xff] %vm3786_vm2, %v3782_v38  ;;  %v3753_v20 = vmul.f32 0.5, %v3721_v37 }
 0x219   : > { %v3752_v50 = vmul.f32 0.5, %v3720_v16 }
 0x21a   : > { %v3785_v54 = vsel %vm3625_vm1, %v3622_v53, %v3753_v20 }
 0x21b   : > { %3818 = vst.msk [vmem:[%s6449_s13 + $0xf8] sm:$0xff] %vm3786_vm2, %v3785_v54  ;;  %v3784_v1 = vsel %vm3625_vm1, %v3621_v19, %v3752_v50 }
 0x21c   : > { %3817 = vst.msk [vmem:[%s6449_s13 + $0xf0] sm:$0xff] %vm3786_vm2, %v3784_v1 }
 0x21d PF: > { %s13_s12 = sadd.s32 1, %s5450_s12  }
 0x21e   : > { %p10_p4 = scmp.ge.s32.totalorder %s13_s12, 4  }
 0x220   :  { %12 = sbr.rel (!%p10_p4) target bundleno = 1 (0x1), region = 64 }

</bundles_post_ra>
